<compile_context>
chip_gen: v6e
topology: v6e:2x2x1
jax: 0.10.0
libtpu: 0.0.40
codegen_flags: <defaults>
</compile_context>

<pallas_src>
import jax
import jax.numpy as jnp
from jax import lax
from jax.experimental import pallas as pl
from jax.experimental.pallas import tpu as pltpu  # noqa: F401  (TPU backend)

BN_EPS = 1e-5
LANE = 128
SUBLANE = 8


def _ceil_to(n, m):
    return ((n + m - 1) // m) * m


def _pad2(a, rows, cols):
    r, c = a.shape
    return jnp.pad(a, ((0, rows - r), (0, cols - c)))


# ------------------------- Pallas kernels -------------------------

def _conv_relu_pool_kernel(p_ref, w_ref, b_ref, o_ref):
    """Fused valid-conv (as im2col matmul) + bias + ReLU + 2x2 maxpool.

    p_ref: (4, Mp, K) bf16 -- one im2col patch matrix per 2x2 pool position.
    w_ref: (K, OC_pad) bf16;  b_ref: (1, OC_pad) f32;  o_ref: (Mp, OC_pad) bf16.
    relu(max_q(p_q @ W) + b) == maxpool(relu(conv)) since bias is shared.
    """
    w = w_ref[...]
    z = jnp.dot(p_ref[0], w, preferred_element_type=jnp.float32)
    for q in range(1, 4):
        z = jnp.maximum(z, jnp.dot(p_ref[q], w, preferred_element_type=jnp.float32))
    y = jnp.maximum(z + b_ref[...], 0.0)
    o_ref[...] = y.astype(o_ref.dtype)


def _make_fc_head_kernel(n_hidden, num_classes):
    """Single fused kernel: fc1+ReLU -> [FC(+folded BN)+ReLU]*n -> logits -> softmax."""
    n_in = 3 + 2 * n_hidden + 2

    def kernel(*refs):
        in_refs, out_refs = refs[:n_in], refs[n_in:]
        h_ref, w1_ref, b1_ref = in_refs[0], in_refs[1], in_refs[2]

        # fc1 + ReLU  (feat)
        feat = jnp.maximum(
            jnp.dot(h_ref[...], w1_ref[...], preferred_element_type=jnp.float32)
            + b1_ref[...], 0.0)
        out_refs[0][...] = feat

        # hidden FC layers; BatchNorm already folded into w/b (eval mode, domain 0);
        # Dropout is identity in eval mode.
        x = feat
        for k in range(n_hidden):
            w_ref, b_ref = in_refs[3 + 2 * k], in_refs[4 + 2 * k]
            x = jnp.maximum(
                jnp.dot(x.astype(jnp.bfloat16), w_ref[...],
                        preferred_element_type=jnp.float32) + b_ref[...], 0.0)
            out_refs[1 + k][...] = x

        # logits
        wl_ref, bl_ref = in_refs[3 + 2 * n_hidden], in_refs[4 + 2 * n_hidden]
        logits = jnp.dot(x.astype(jnp.bfloat16), wl_ref[...],
                         preferred_element_type=jnp.float32) + bl_ref[...]
        out_refs[1 + n_hidden][...] = logits

        # softmax / log_softmax masked to the first `num_classes` lanes
        mask = lax.broadcasted_iota(jnp.int32, logits.shape, 1) < num_classes
        lm = jnp.where(mask, logits, jnp.full_like(logits, -1e30))
        m = jnp.max(lm, axis=1, keepdims=True)
        z = logits - m
        e = jnp.where(mask, jnp.exp(z), 0.0)
        s = jnp.sum(e, axis=1, keepdims=True)
        out_refs[2 + n_hidden][...] = e * pl.reciprocal(s, approx=True)
        out_refs[3 + n_hidden][...] = z - jnp.log(s)

    return kernel


# ------------------------- wrappers -------------------------

def conv_relu_pool(x_nhwc, w_mat, b_row, oc, kh, kw):
    """x_nhwc: (N,H,W,C) bf16; w_mat: (KH*KW*C, OC_pad) bf16; b_row: (1, OC_pad) f32.

    Builds the im2col patch matrices directly in NHWC order (no transposes) for the
    four 2x2-pool positions, then runs the fused conv+ReLU+pool Pallas kernel.
    Returns pooled NHWC activations (N, PH, PW, OC) in bf16.
    """
    N, H, W, C = x_nhwc.shape
    OH, OW = H - kh + 1, W - kw + 1
    PH, PW = OH // 2, OW // 2
    kdim = kh * kw * C
    oc_pad = w_mat.shape[1]

    pmats = []
    for a in range(2):
        for b in range(2):
            taps = []
            for i in range(kh):
                for j in range(kw):
                    taps.append(x_nhwc[:, a + i:a + i + 2 * PH:2,
                                          b + j:b + j + 2 * PW:2, :])
            # (N, PH, PW, KH*KW, C) -> contiguous reshape, column order (i, j, c)
            pmats.append(jnp.stack(taps, axis=3).reshape(N * PH * PW, kdim))
    p4 = jnp.stack(pmats, axis=0).astype(jnp.bfloat16)          # (4, Mp, K)

    y = pl.pallas_call(
        _conv_relu_pool_kernel,
        out_shape=jax.ShapeDtypeStruct((N * PH * PW, oc_pad), jnp.bfloat16),
    )(p4, w_mat, b_row)
    return y[:, :oc].reshape(N, PH, PW, oc)


def fc_head(prep, h_bf16, batch):
    """Fused FC head. h_bf16: (batch, 800) bf16, NHWC-flatten order."""
    n_hidden = len(prep['hidden'])
    m_pad = _ceil_to(batch, SUBLANE)
    h = jnp.pad(h_bf16, ((0, m_pad - batch), (0, 0)))

    inputs = [h, prep['fc1_w'], prep['fc1_b']]
    out_shapes = [jax.ShapeDtypeStruct((m_pad, prep['fc1_w'].shape[1]), jnp.float32)]
    for layer in prep['hidden']:
        inputs += [layer['w'], layer['b']]
        out_shapes.append(
            jax.ShapeDtypeStruct((m_pad, layer['w'].shape[1]), jnp.float32))
    inputs += [prep['logits_w'], prep['logits_b']]
    ncls_pad = prep['logits_w'].shape[1]
    out_shapes += [jax.ShapeDtypeStruct((m_pad, ncls_pad), jnp.float32)] * 3

    kernel = _make_fc_head_kernel(n_hidden, prep['num_classes'])
    return pl.pallas_call(kernel, out_shape=tuple(out_shapes))(*inputs)


# ------------------------- parameters -------------------------

def kaiming_normal(key, shape, fan_in):
    return jax.random.normal(key, shape, dtype=jnp.float32) * jnp.sqrt(2.0 / fan_in)


def init_params(key, num_classes=10, fc_hidden_dims=(64,)):
    """PyTorch-convention parameters (conv: OCxCxKHxKW, fc1 rows in NCHW-flatten order)."""
    keys = jax.random.split(key, 6)
    params = {}
    params['conv1_w'] = kaiming_normal(keys[0], (20, 1, 5, 5), fan_in=1 * 5 * 5)
    params['conv1_b'] = jnp.zeros((20,), jnp.float32)
    params['conv2_w'] = kaiming_normal(keys[1], (50, 20, 5, 5), fan_in=20 * 5 * 5)
    params['conv2_b'] = jnp.zeros((50,), jnp.float32)
    params['fc1_w'] = kaiming_normal(keys[2], (800, 500), fan_in=800)  # (in, out)
    params['fc1_b'] = jnp.zeros((500,), jnp.float32)

    in_dim = 500
    hidden = []
    for k, out_dim in enumerate(fc_hidden_dims):
        wkey = jax.random.fold_in(keys[3], k)
        hidden.append(dict(
            w=kaiming_normal(wkey, (in_dim, out_dim), fan_in=in_dim),
            b=jnp.zeros((out_dim,), jnp.float32),
            gamma=jnp.ones((out_dim,), jnp.float32),
            beta=jnp.zeros((out_dim,), jnp.float32),
            mean=jnp.zeros((out_dim,), jnp.float32),   # running stats (domain 0)
            var=jnp.ones((out_dim,), jnp.float32),
        ))
        in_dim = out_dim
    params['hidden'] = hidden
    params['logits_w'] = kaiming_normal(keys[4], (in_dim, num_classes), fan_in=in_dim)
    params['logits_b'] = jnp.zeros((num_classes,), jnp.float32)
    return params


def prepare_params(params, num_classes=10):
    """One-time prep: NHWC conv weights, BN folding, lane padding, bf16 casts."""
    prep = {'num_classes': num_classes}

    # Conv weights: (OC, C, KH, KW) -> (KH*KW*C, OC_pad) bf16; bias -> (1, OC_pad) f32.
    for name in ('conv1', 'conv2'):
        w = params[f'{name}_w']
        oc, c, kh, kw = w.shape
        wm = jnp.transpose(w, (2, 3, 1, 0)).reshape(kh * kw * c, oc)
        oc_pad = _ceil_to(oc, LANE)
        prep[f'{name}_w'] = _pad2(wm, kh * kw * c, oc_pad).astype(jnp.bfloat16)
        prep[f'{name}_b'] = _pad2(params[f'{name}_b'].reshape(1, oc), 1,
                                  oc_pad).astype(jnp.float32)
        prep[f'{name}_oc'] = oc
        prep[f'{name}_k'] = (kh, kw)

    # fc1: permute input rows from PyTorch NCHW-flatten (c,h,w) to NHWC-flatten (h,w,c).
    w1 = params['fc1_w']
    feat_dim = w1.shape[1]
    c2 = params['conv2_w'].shape[0]
    spatial = int(round((w1.shape[0] / c2) ** 0.5))
    w1 = (w1.reshape(c2, spatial, spatial, feat_dim)
             .transpose(1, 2, 0, 3).reshape(w1.shape[0], feat_dim))
    feat_pad = _ceil_to(feat_dim, LANE)
    prep['fc1_w'] = _pad2(w1, w1.shape[0], feat_pad).astype(jnp.bfloat16)
    prep['fc1_b'] = _pad2(params['fc1_b'].reshape(1, feat_dim), 1,
                          feat_pad).astype(jnp.float32)
    prep['feat_dim'] = feat_dim

    # Hidden FC layers: fold eval-mode BatchNorm1d (running stats) into w/b, pad, bf16.
    hidden, hidden_dims = [], []
    in_pad = feat_pad
    for layer in params['hidden']:
        w, b = layer['w'], layer['b']
        out_dim = w.shape[1]
        scale = layer['gamma'] * lax.rsqrt(layer['var'] + BN_EPS)
        wf = w * scale[None, :]
        bf = (b - layer['mean']) * scale + layer['beta']
        out_pad = _ceil_to(out_dim, LANE)
        hidden.append({
            'w': _pad2(wf, in_pad, out_pad).astype(jnp.bfloat16),
            'b': _pad2(bf.reshape(1, out_dim), 1, out_pad).astype(jnp.float32),
        })
        hidden_dims.append(out_dim)
        in_pad = out_pad
    prep['hidden'] = hidden
    prep['hidden_dims'] = tuple(hidden_dims)

    # logits layer
    wl, bl = params['logits_w'], params['logits_b']
    ncls_pad = _ceil_to(num_classes, LANE)
    prep['logits_w'] = _pad2(wl, in_pad, ncls_pad).astype(jnp.bfloat16)
    prep['logits_b'] = _pad2(bl.reshape(1, num_classes), 1,
                             ncls_pad).astype(jnp.float32)
    return prep


# ------------------------- forward -------------------------

def lenet_sm_forward(prep, x):
    """Reproduces LeNet_sm.forward (eval mode). x: (N, 1, 28, 28) NCHW."""
    n = x.shape[0]
    # Single layout change: NCHW -> NHWC, kept NHWC through the conv stack.
    xh = jnp.transpose(x, (0, 2, 3, 1)).astype(jnp.bfloat16)

    kh1, kw1 = prep['conv1_k']
    kh2, kw2 = prep['conv2_k']
    h1 = conv_relu_pool(xh, prep['conv1_w'], prep['conv1_b'],
                        prep['conv1_oc'], kh1, kw1)          # (N, 12, 12, 20)
    h2 = conv_relu_pool(h1, prep['conv2_w'], prep['conv2_b'],
                        prep['conv2_oc'], kh2, kw2)          # (N, 4, 4, 50)
    h = h2.reshape(n, -1)    # NHWC flatten; fc1 weight rows were permuted to match

    outs = fc_head(prep, h, n)

    n_hidden = len(prep['hidden'])
    ncls = prep['num_classes']
    to_select = {'feat': outs[0][:n, :prep['feat_dim']]}
    for k in range(n_hidden):
        to_select[str(k)] = outs[1 + k][:n, :prep['hidden_dims'][k]]
    to_select['logits'] = outs[1 + n_hidden][:n, :ncls]
    to_select['probs'] = outs[2 + n_hidden][:n, :ncls]
    to_select['log_probs'] = outs[3 + n_hidden][:n, :ncls]
    return to_select


if __name__ == "__main__":
    key = jax.random.PRNGKey(0)
    kx, kp = jax.random.split(key)
    # NCHW input, MNIST-like geometry consistent with the LeNet conv stack.
    x = jax.random.normal(kx, (2, 1, 28, 28), dtype=jnp.float32)
    params = init_params(kp, num_classes=10, fc_hidden_dims=(64,))
    prep = prepare_params(params, num_classes=10)

    fwd = jax.jit(lambda inp: lenet_sm_forward(prep, inp))
    out = fwd(x)
    jax.block_until_ready(out)

    assert out['feat'].shape == (2, 500)
    assert out['0'].shape == (2, 64)
    assert out['logits'].shape == (2, 10)
    assert out['probs'].shape == (2, 10) and out['log_probs'].shape == (2, 10)
    print("KERNEL_OK")
</pallas_src>

<mosaic_0001>
module attributes {stable_mosaic.version = 11 : i64} {
  func.func @_conv_relu_pool_kernel(%arg0: memref<4x288x25xbf16, #tpu.memory_space<vmem>>, %arg1: memref<25x128xbf16, #tpu.memory_space<vmem>>, %arg2: memref<1x128xf32, #tpu.memory_space<vmem>>, %arg3: memref<288x128xbf16, #tpu.memory_space<vmem>>) attributes {dimension_semantics = [], scalar_prefetch = 0 : i64, scratch_operands = 0 : i64, tpu.core_type = #tpu.core_type<tc>} {
    %c0 = arith.constant 0 : index
    %c0_0 = arith.constant 0 : index
    %0 = vector.load %arg1[%c0, %c0_0] : memref<25x128xbf16, #tpu.memory_space<vmem>>, vector<25x128xbf16>
    %c0_1 = arith.constant 0 : index
    %c0_2 = arith.constant 0 : index
    %c0_3 = arith.constant 0 : index
    %1 = vector.load %arg0[%c0_1, %c0_2, %c0_3] : memref<4x288x25xbf16, #tpu.memory_space<vmem>>, vector<1x288x25xbf16>
    %2 = vector.shape_cast %1 : vector<1x288x25xbf16> to vector<288x25xbf16>
    %cst = arith.constant dense<0.000000e+00> : vector<288x128xf32>
    %3 = tpu.matmul %2, %0, %cst {dimension_numbers = #tpu.dot_dimension_numbers<[1], [0], [0], [1], [0, 0, 1, 1], [], []>} : vector<288x25xbf16>, vector<25x128xbf16>, vector<288x128xf32> -> vector<288x128xf32>
    %c1 = arith.constant 1 : index
    %c0_4 = arith.constant 0 : index
    %c0_5 = arith.constant 0 : index
    %4 = vector.load %arg0[%c1, %c0_4, %c0_5] : memref<4x288x25xbf16, #tpu.memory_space<vmem>>, vector<1x288x25xbf16>
    %5 = vector.shape_cast %4 : vector<1x288x25xbf16> to vector<288x25xbf16>
    %cst_6 = arith.constant dense<0.000000e+00> : vector<288x128xf32>
    %6 = tpu.matmul %5, %0, %cst_6 {dimension_numbers = #tpu.dot_dimension_numbers<[1], [0], [0], [1], [0, 0, 1, 1], [], []>} : vector<288x25xbf16>, vector<25x128xbf16>, vector<288x128xf32> -> vector<288x128xf32>
    %7 = arith.maximumf %3, %6 : vector<288x128xf32>
    %c2 = arith.constant 2 : index
    %c0_7 = arith.constant 0 : index
    %c0_8 = arith.constant 0 : index
    %8 = vector.load %arg0[%c2, %c0_7, %c0_8] : memref<4x288x25xbf16, #tpu.memory_space<vmem>>, vector<1x288x25xbf16>
    %9 = vector.shape_cast %8 : vector<1x288x25xbf16> to vector<288x25xbf16>
    %cst_9 = arith.constant dense<0.000000e+00> : vector<288x128xf32>
    %10 = tpu.matmul %9, %0, %cst_9 {dimension_numbers = #tpu.dot_dimension_numbers<[1], [0], [0], [1], [0, 0, 1, 1], [], []>} : vector<288x25xbf16>, vector<25x128xbf16>, vector<288x128xf32> -> vector<288x128xf32>
    %11 = arith.maximumf %7, %10 : vector<288x128xf32>
    %c3 = arith.constant 3 : index
    %c0_10 = arith.constant 0 : index
    %c0_11 = arith.constant 0 : index
    %12 = vector.load %arg0[%c3, %c0_10, %c0_11] : memref<4x288x25xbf16, #tpu.memory_space<vmem>>, vector<1x288x25xbf16>
    %13 = vector.shape_cast %12 : vector<1x288x25xbf16> to vector<288x25xbf16>
    %cst_12 = arith.constant dense<0.000000e+00> : vector<288x128xf32>
    %14 = tpu.matmul %13, %0, %cst_12 {dimension_numbers = #tpu.dot_dimension_numbers<[1], [0], [0], [1], [0, 0, 1, 1], [], []>} : vector<288x25xbf16>, vector<25x128xbf16>, vector<288x128xf32> -> vector<288x128xf32>
    %15 = arith.maximumf %11, %14 : vector<288x128xf32>
    %c0_13 = arith.constant 0 : index
    %c0_14 = arith.constant 0 : index
    %16 = vector.load %arg2[%c0_13, %c0_14] : memref<1x128xf32, #tpu.memory_space<vmem>>, vector<1x128xf32>
    %17 = vector.broadcast %16 : vector<1x128xf32> to vector<288x128xf32>
    %18 = arith.addf %15, %17 : vector<288x128xf32>
    %cst_15 = arith.constant 0.000000e+00 : f32
    %19 = vector.broadcast %cst_15 : f32 to vector<288x128xf32>
    %20 = arith.maximumf %18, %19 : vector<288x128xf32>
    %21 = arith.truncf %20 : vector<288x128xf32> to vector<288x128xbf16>
    %c0_16 = arith.constant 0 : index
    %c0_17 = arith.constant 0 : index
    %22 = vector.load %arg3[%c0_16, %c0_17] : memref<288x128xbf16, #tpu.memory_space<vmem>>, vector<288x128xbf16>
    tpu.vector_store %arg3[%c0_16, %c0_17], %21 {strides = array<i32>} : memref<288x128xbf16, #tpu.memory_space<vmem>>, vector<288x128xbf16>,
    return
  }
}

module attributes {stable_mosaic.version = 11 : i64} {
  func.func @_conv_relu_pool_kernel(%arg0: memref<4x32x500xbf16, #tpu.memory_space<vmem>>, %arg1: memref<500x128xbf16, #tpu.memory_space<vmem>>, %arg2: memref<1x128xf32, #tpu.memory_space<vmem>>, %arg3: memref<32x128xbf16, #tpu.memory_space<vmem>>) attributes {dimension_semantics = [], scalar_prefetch = 0 : i64, scratch_operands = 0 : i64, tpu.core_type = #tpu.core_type<tc>} {
    %c0 = arith.constant 0 : index
    %c0_0 = arith.constant 0 : index
    %0 = vector.load %arg1[%c0, %c0_0] : memref<500x128xbf16, #tpu.memory_space<vmem>>, vector<500x128xbf16>
    %c0_1 = arith.constant 0 : index
    %c0_2 = arith.constant 0 : index
    %c0_3 = arith.constant 0 : index
    %1 = vector.load %arg0[%c0_1, %c0_2, %c0_3] : memref<4x32x500xbf16, #tpu.memory_space<vmem>>, vector<1x32x500xbf16>
    %2 = vector.shape_cast %1 : vector<1x32x500xbf16> to vector<32x500xbf16>
    %cst = arith.constant dense<0.000000e+00> : vector<32x128xf32>
    %3 = tpu.matmul %2, %0, %cst {dimension_numbers = #tpu.dot_dimension_numbers<[1], [0], [0], [1], [0, 0, 1, 1], [], []>} : vector<32x500xbf16>, vector<500x128xbf16>, vector<32x128xf32> -> vector<32x128xf32>
    %c1 = arith.constant 1 : index
    %c0_4 = arith.constant 0 : index
    %c0_5 = arith.constant 0 : index
    %4 = vector.load %arg0[%c1, %c0_4, %c0_5] : memref<4x32x500xbf16, #tpu.memory_space<vmem>>, vector<1x32x500xbf16>
    %5 = vector.shape_cast %4 : vector<1x32x500xbf16> to vector<32x500xbf16>
    %cst_6 = arith.constant dense<0.000000e+00> : vector<32x128xf32>
    %6 = tpu.matmul %5, %0, %cst_6 {dimension_numbers = #tpu.dot_dimension_numbers<[1], [0], [0], [1], [0, 0, 1, 1], [], []>} : vector<32x500xbf16>, vector<500x128xbf16>, vector<32x128xf32> -> vector<32x128xf32>
    %7 = arith.maximumf %3, %6 : vector<32x128xf32>
    %c2 = arith.constant 2 : index
    %c0_7 = arith.constant 0 : index
    %c0_8 = arith.constant 0 : index
    %8 = vector.load %arg0[%c2, %c0_7, %c0_8] : memref<4x32x500xbf16, #tpu.memory_space<vmem>>, vector<1x32x500xbf16>
    %9 = vector.shape_cast %8 : vector<1x32x500xbf16> to vector<32x500xbf16>
    %cst_9 = arith.constant dense<0.000000e+00> : vector<32x128xf32>
    %10 = tpu.matmul %9, %0, %cst_9 {dimension_numbers = #tpu.dot_dimension_numbers<[1], [0], [0], [1], [0, 0, 1, 1], [], []>} : vector<32x500xbf16>, vector<500x128xbf16>, vector<32x128xf32> -> vector<32x128xf32>
    %11 = arith.maximumf %7, %10 : vector<32x128xf32>
    %c3 = arith.constant 3 : index
    %c0_10 = arith.constant 0 : index
    %c0_11 = arith.constant 0 : index
    %12 = vector.load %arg0[%c3, %c0_10, %c0_11] : memref<4x32x500xbf16, #tpu.memory_space<vmem>>, vector<1x32x500xbf16>
    %13 = vector.shape_cast %12 : vector<1x32x500xbf16> to vector<32x500xbf16>
    %cst_12 = arith.constant dense<0.000000e+00> : vector<32x128xf32>
    %14 = tpu.matmul %13, %0, %cst_12 {dimension_numbers = #tpu.dot_dimension_numbers<[1], [0], [0], [1], [0, 0, 1, 1], [], []>} : vector<32x500xbf16>, vector<500x128xbf16>, vector<32x128xf32> -> vector<32x128xf32>
    %15 = arith.maximumf %11, %14 : vector<32x128xf32>
    %c0_13 = arith.constant 0 : index
    %c0_14 = arith.constant 0 : index
    %16 = vector.load %arg2[%c0_13, %c0_14] : memref<1x128xf32, #tpu.memory_space<vmem>>, vector<1x128xf32>
    %17 = vector.broadcast %16 : vector<1x128xf32> to vector<32x128xf32>
    %18 = arith.addf %15, %17 : vector<32x128xf32>
    %cst_15 = arith.constant 0.000000e+00 : f32
    %19 = vector.broadcast %cst_15 : f32 to vector<32x128xf32>
    %20 = arith.maximumf %18, %19 : vector<32x128xf32>
    %21 = arith.truncf %20 : vector<32x128xf32> to vector<32x128xbf16>
    %c0_16 = arith.constant 0 : index
    %c0_17 = arith.constant 0 : index
    %22 = vector.load %arg3[%c0_16, %c0_17] : memref<32x128xbf16, #tpu.memory_space<vmem>>, vector<32x128xbf16>
    tpu.vector_store %arg3[%c0_16, %c0_17], %21 {strides = array<i32>} : memref<32x128xbf16, #tpu.memory_space<vmem>>, vector<32x128xbf16>,
    return
  }
}

module attributes {stable_mosaic.version = 11 : i64} {
  func.func @kernel(%arg0: memref<8x800xbf16, #tpu.memory_space<vmem>>, %arg1: memref<800x512xbf16, #tpu.memory_space<vmem>>, %arg2: memref<1x512xf32, #tpu.memory_space<vmem>>, %arg3: memref<512x128xbf16, #tpu.memory_space<vmem>>, %arg4: memref<1x128xf32, #tpu.memory_space<vmem>>, %arg5: memref<128x128xbf16, #tpu.memory_space<vmem>>, %arg6: memref<1x128xf32, #tpu.memory_space<vmem>>, %arg7: memref<8x512xf32, #tpu.memory_space<vmem>>, %arg8: memref<8x128xf32, #tpu.memory_space<vmem>>, %arg9: memref<8x128xf32, #tpu.memory_space<vmem>>, %arg10: memref<8x128xf32, #tpu.memory_space<vmem>>, %arg11: memref<8x128xf32, #tpu.memory_space<vmem>>) attributes {dimension_semantics = [], scalar_prefetch = 0 : i64, scratch_operands = 0 : i64, tpu.core_type = #tpu.core_type<tc>} {
    %c0 = arith.constant 0 : index
    %c0_0 = arith.constant 0 : index
    %0 = vector.load %arg0[%c0, %c0_0] : memref<8x800xbf16, #tpu.memory_space<vmem>>, vector<8x800xbf16>
    %c0_1 = arith.constant 0 : index
    %c0_2 = arith.constant 0 : index
    %1 = vector.load %arg1[%c0_1, %c0_2] : memref<800x512xbf16, #tpu.memory_space<vmem>>, vector<800x512xbf16>
    %cst = arith.constant dense<0.000000e+00> : vector<8x512xf32>
    %2 = tpu.matmul %0, %1, %cst {dimension_numbers = #tpu.dot_dimension_numbers<[1], [0], [0], [1], [0, 0, 1, 1], [], []>} : vector<8x800xbf16>, vector<800x512xbf16>, vector<8x512xf32> -> vector<8x512xf32>
    %c0_3 = arith.constant 0 : index
    %c0_4 = arith.constant 0 : index
    %3 = vector.load %arg2[%c0_3, %c0_4] : memref<1x512xf32, #tpu.memory_space<vmem>>, vector<1x512xf32>
    %4 = vector.broadcast %3 : vector<1x512xf32> to vector<8x512xf32>
    %5 = arith.addf %2, %4 : vector<8x512xf32>
    %cst_5 = arith.constant 0.000000e+00 : f32
    %6 = vector.broadcast %cst_5 : f32 to vector<8x512xf32>
    %7 = arith.maximumf %5, %6 : vector<8x512xf32>
    %c0_6 = arith.constant 0 : index
    %c0_7 = arith.constant 0 : index
    %8 = vector.load %arg7[%c0_6, %c0_7] : memref<8x512xf32, #tpu.memory_space<vmem>>, vector<8x512xf32>
    tpu.vector_store %arg7[%c0_6, %c0_7], %7 {strides = array<i32>} : memref<8x512xf32, #tpu.memory_space<vmem>>, vector<8x512xf32>,
    %9 = arith.truncf %7 : vector<8x512xf32> to vector<8x512xbf16>
    %c0_8 = arith.constant 0 : index
    %c0_9 = arith.constant 0 : index
    %10 = vector.load %arg3[%c0_8, %c0_9] : memref<512x128xbf16, #tpu.memory_space<vmem>>, vector<512x128xbf16>
    %cst_10 = arith.constant dense<0.000000e+00> : vector<8x128xf32>
    %11 = tpu.matmul %9, %10, %cst_10 {dimension_numbers = #tpu.dot_dimension_numbers<[1], [0], [0], [1], [0, 0, 1, 1], [], []>} : vector<8x512xbf16>, vector<512x128xbf16>, vector<8x128xf32> -> vector<8x128xf32>
    %c0_11 = arith.constant 0 : index
    %c0_12 = arith.constant 0 : index
    %12 = vector.load %arg4[%c0_11, %c0_12] : memref<1x128xf32, #tpu.memory_space<vmem>>, vector<1x128xf32>
    %13 = vector.broadcast %12 : vector<1x128xf32> to vector<8x128xf32>
    %14 = arith.addf %11, %13 : vector<8x128xf32>
    %cst_13 = arith.constant 0.000000e+00 : f32
    %15 = vector.broadcast %cst_13 : f32 to vector<8x128xf32>
    %16 = arith.maximumf %14, %15 : vector<8x128xf32>
    %c0_14 = arith.constant 0 : index
    %c0_15 = arith.constant 0 : index
    %17 = vector.load %arg8[%c0_14, %c0_15] : memref<8x128xf32, #tpu.memory_space<vmem>>, vector<8x128xf32>
    tpu.vector_store %arg8[%c0_14, %c0_15], %16 {strides = array<i32>} : memref<8x128xf32, #tpu.memory_space<vmem>>, vector<8x128xf32>,
    %18 = arith.truncf %16 : vector<8x128xf32> to vector<8x128xbf16>
    %c0_16 = arith.constant 0 : index
    %c0_17 = arith.constant 0 : index
    %19 = vector.load %arg5[%c0_16, %c0_17] : memref<128x128xbf16, #tpu.memory_space<vmem>>, vector<128x128xbf16>
    %cst_18 = arith.constant dense<0.000000e+00> : vector<8x128xf32>
    %20 = tpu.matmul %18, %19, %cst_18 {dimension_numbers = #tpu.dot_dimension_numbers<[1], [0], [0], [1], [0, 0, 1, 1], [], []>} : vector<8x128xbf16>, vector<128x128xbf16>, vector<8x128xf32> -> vector<8x128xf32>
    %c0_19 = arith.constant 0 : index
    %c0_20 = arith.constant 0 : index
    %21 = vector.load %arg6[%c0_19, %c0_20] : memref<1x128xf32, #tpu.memory_space<vmem>>, vector<1x128xf32>
    %22 = vector.broadcast %21 : vector<1x128xf32> to vector<8x128xf32>
    %23 = arith.addf %20, %22 : vector<8x128xf32>
    %c0_21 = arith.constant 0 : index
    %c0_22 = arith.constant 0 : index
    %24 = vector.load %arg9[%c0_21, %c0_22] : memref<8x128xf32, #tpu.memory_space<vmem>>, vector<8x128xf32>
    tpu.vector_store %arg9[%c0_21, %c0_22], %23 {strides = array<i32>} : memref<8x128xf32, #tpu.memory_space<vmem>>, vector<8x128xf32>,
    %25 = tpu.iota {dimensions = array<i32: 1>} : vector<8x128xi32>
    %c10_i32 = arith.constant 10 : i32
    %26 = vector.broadcast %c10_i32 : i32 to vector<8x128xi32>
    %27 = arith.cmpi slt, %25, %26 : vector<8x128xi32>
    %cst_23 = arith.constant -1.000000e+30 : f32
    %28 = vector.broadcast %cst_23 : f32 to vector<8x128xf32>
    %29 = arith.select %27, %23, %28 : vector<8x128xi1>, vector<8x128xf32>
    %cst_24 = arith.constant dense<0xFF800000> : vector<8xf32>
    %30 = vector.multi_reduction <maximumf>, %29, %cst_24 [1] : vector<8x128xf32> to vector<8xf32>
    %31 = vector.shape_cast %30 : vector<8xf32> to vector<8x1xf32>
    %32 = vector.broadcast %31 : vector<8x1xf32> to vector<8x128xf32>
    %33 = arith.subf %23, %32 : vector<8x128xf32>
    %34 = math.exp %33 : vector<8x128xf32>
    %cst_25 = arith.constant 0.000000e+00 : f32
    %35 = vector.broadcast %cst_25 : f32 to vector<8x128xf32>
    %36 = arith.select %27, %34, %35 : vector<8x128xi1>, vector<8x128xf32>
    %cst_26 = arith.constant dense<0.000000e+00> : vector<8xf32>
    %37 = vector.multi_reduction <add>, %36, %cst_26 [1] : vector<8x128xf32> to vector<8xf32>
    %38 = vector.shape_cast %37 : vector<8xf32> to vector<8x1xf32>
    %39 = tpu.reciprocal %38 {approx = true} : vector<8x1xf32> -> vector<8x1xf32>
    %40 = vector.broadcast %39 : vector<8x1xf32> to vector<8x128xf32>
    %41 = arith.mulf %36, %40 : vector<8x128xf32>
    %c0_27 = arith.constant 0 : index
    %c0_28 = arith.constant 0 : index
    %42 = vector.load %arg10[%c0_27, %c0_28] : memref<8x128xf32, #tpu.memory_space<vmem>>, vector<8x128xf32>
    tpu.vector_store %arg10[%c0_27, %c0_28], %41 {strides = array<i32>} : memref<8x128xf32, #tpu.memory_space<vmem>>, vector<8x128xf32>,
    %43 = math.log %38 : vector<8x1xf32>
    %44 = vector.broadcast %43 : vector<8x1xf32> to vector<8x128xf32>
    %45 = arith.subf %33, %44 : vector<8x128xf32>
    %c0_29 = arith.constant 0 : index
    %c0_30 = arith.constant 0 : index
    %46 = vector.load %arg11[%c0_29, %c0_30] : memref<8x128xf32, #tpu.memory_space<vmem>>, vector<8x128xf32>
    tpu.vector_store %arg11[%c0_29, %c0_30], %45 {strides = array<i32>} : memref<8x128xf32, #tpu.memory_space<vmem>>, vector<8x128xf32>,
    return
  }
}

</mosaic_0001>

<bundles_post_ra>
// kernel: _lambda_.3
= control target key start
LH: loop header
LB: loop body
LE: loop exit
PB: predicated region body
PF: predicated region fallthrough
CT: control target
= control target key end

     0   :  { %vm211_vm0 = vcmask 1043456   ;;  %vm212_vm1 = vcmask 1044480   ;;  %v2589_v1 = vmov 65535   ;;  %vm156_vm2 = vcmask 203776   ;;  %s3323_s1 = inlined_call_operand.vmem [shape: bf16[25,128], index: 1, kind: input, shape index: {}]   ;;  %s3324_s0 = inlined_call_operand.vmem [shape: bf16[4,288,25], index: 0, kind: input, shape index: {}]   ;;  %s3325_s2 = inlined_call_operand.vmem [shape: f32[1,128], index: 2, kind: input, shape index: {}]   ;;  %s3326_s3 = inlined_call_operand.vmem [shape: bf16[288,128], index: 3, kind: output, shape index: {}]  }
   0x1   :  { %v2515_v0 = vld [vmem:[%s3323_s1 + $0x8] sm:$0x1f]   ;;  %v213_v2 = vsel %vm211_vm0, 4294967295, %v2589_v1  ;;  %v2517_v4 = vld [vmem:[%s3324_s0] sm:$0xff]   ;;  %v2518_v7 = vld [vmem:[%s3324_s0 + $0x90] sm:$0xff]  }
   0x2   :  { %v214_v3 = vsel %vm212_vm1, %v213_v2, 0  ;;  %v2516_v6 = vld [vmem:[%s3323_s1] sm:$0xff]   ;;  %2358 = vmatprep.mubr.msk.bf16.mxu0 %vm156_vm2, %v2517_v4  ;;  %2398 = vmatprep.mubr.msk.bf16.mxu1 %vm156_vm2, %v2518_v7  ;;  %v2519_v8 = vld [vmem:[%s3324_s0 + $0x8] sm:$0xff]   ;;  %v2520_v9 = vld [vmem:[%s3324_s0 + $0x98] sm:$0xff]  }
   0x3   :  { %v216_v5 = vand.u32 %v2515_v0, %v214_v3  ;;  %v2521_v10 = vld [vmem:[%s3324_s0 + $0x10] sm:$0xff]   ;;  %v2522_v11 = vld [vmem:[%s3324_s0 + $0xa0] sm:$0xff]   ;;  %v2523_v12 = vld [vmem:[%s3324_s0 + $0x18] sm:$0xff]  }
   0x4   :  { %v2524_v13 = vld [vmem:[%s3324_s0 + $0xa8] sm:$0xff]   ;;  %v2525_v14 = vld [vmem:[%s3324_s0 + $0x20] sm:$0xff]   ;;  %v2526_v15 = vld [vmem:[%s3324_s0 + $0xb0] sm:$0xff]  }
   0x5   :  { %2354 = vmatprep.subr.bf16.mxu0 %v216_v5  ;;  %2394 = vmatprep.subr.bf16.mxu1 %v216_v5  ;;  %v2527_v16 = vld [vmem:[%s3324_s0 + $0x28] sm:$0xff]   ;;  %v2528_v17 = vld [vmem:[%s3324_s0 + $0xb8] sm:$0xff]   ;;  %v2529_v18 = vld [vmem:[%s3324_s0 + $0x30] sm:$0xff]  }
   0x6   :  { %2355 = vmatpush3.bf16.msra.mxu0 %v216_v5  ;;  %2395 = vmatpush3.bf16.msra.mxu1 %v216_v5  ;;  %v2530_v19 = vld [vmem:[%s3324_s0 + $0xc0] sm:$0xff]   ;;  %v2531_v20 = vld [vmem:[%s3324_s0 + $0x38] sm:$0xff]   ;;  %v2532_v21 = vld [vmem:[%s3324_s0 + $0xc8] sm:$0xff]  }
   0x7   :  { %2356 = vmatprep.subr.bf16.mxu0 %v2516_v6  ;;  %2396 = vmatprep.subr.bf16.mxu1 %v2516_v6  ;;  %v2533_v22 = vld [vmem:[%s3324_s0 + $0x40] sm:$0xff]   ;;  %v2534_v23 = vld [vmem:[%s3324_s0 + $0xd0] sm:$0xff]   ;;  %v2535_v24 = vld [vmem:[%s3324_s0 + $0x48] sm:$0xff]  }
   0x8   :  { %v2536_v25 = vld [vmem:[%s3324_s0 + $0xd8] sm:$0xff]   ;;  %v2537_v26 = vld [vmem:[%s3324_s0 + $0x50] sm:$0xff]   ;;  %v2538_v27 = vld [vmem:[%s3324_s0 + $0xe0] sm:$0xff]  }
   0x9   :  { %v2539_v28 = vld [vmem:[%s3324_s0 + $0x58] sm:$0xff]   ;;  %v2540_v29 = vld [vmem:[%s3324_s0 + $0xe8] sm:$0xff]   ;;  %v2541_v30 = vld [vmem:[%s3324_s0 + $0x60] sm:$0xff]  }
   0xa   :  { %2357 = vmatpush3.bf16.msra.mxu0 %v2516_v6  ;;  %2397 = vmatpush3.bf16.msra.mxu1 %v2516_v6  ;;  %v2542_v31 = vld [vmem:[%s3324_s0 + $0xf0] sm:$0xff]   ;;  %v2543_v32 = vld [vmem:[%s3324_s0 + $0x68] sm:$0xff]   ;;  %v2544_v33 = vld [vmem:[%s3324_s0 + $0xf8] sm:$0xff]  }
   0xb   :  { %2434 = vmatprep.subr.bf16.mxu0 %v216_v5  ;;  %2474 = vmatprep.subr.bf16.mxu1 %v216_v5  ;;  %v2545_v34 = vld [vmem:[%s3324_s0 + $0x70] sm:$0xff]   ;;  %v2546_v35 = vld [vmem:[%s3324_s0 + $0x100] sm:$0xff]   ;;  %v2547_v36 = vld [vmem:[%s3324_s0 + $0x78] sm:$0xff]  }
   0xc   :  { %v2548_v37 = vld [vmem:[%s3324_s0 + $0x108] sm:$0xff]   ;;  %v2549_v38 = vld [vmem:[%s3324_s0 + $0x80] sm:$0xff]   ;;  %v2550_v39 = vld [vmem:[%s3324_s0 + $0x110] sm:$0xff]  }
   0xd   :  { %2359 = vmatmul.mubr.msk.bf16.vlgmr.msra.gmra.mxu0 %vm156_vm2, %v2519_v8  ;;  %2399 = vmatmul.mubr.msk.bf16.vlgmr.msra.gmra.mxu1 %vm156_vm2, %v2520_v9  ;;  %v2551_v40 = vld [vmem:[%s3324_s0 + $0x88] sm:$0xff]   ;;  %v2552_v41 = vld [vmem:[%s3324_s0 + $0x118] sm:$0xff]   ;;  %v2553_v42 = vld [vmem:[%s3324_s0 + $0x120] sm:$0xff]  }
   0xe   :  { %2435 = vmatpush3.bf16.msra.mxu0 %v216_v5  ;;  %2475 = vmatpush3.bf16.msra.mxu1 %v216_v5  ;;  %v2554_v43 = vld [vmem:[%s3324_s0 + $0x1b0] sm:$0xff]   ;;  %v2555_v44 = vld [vmem:[%s3324_s0 + $0x128] sm:$0xff]   ;;  %v2556_v45 = vld [vmem:[%s3324_s0 + $0x1b8] sm:$0xff]  }
   0xf   :  { %2362 = vmatprep.mubr.msk.bf16.mxu0 %vm156_vm2, %v2521_v10  ;;  %2402 = vmatprep.mubr.msk.bf16.mxu1 %vm156_vm2, %v2522_v11  ;;  %v2557_v46 = vld [vmem:[%s3324_s0 + $0x130] sm:$0xff]   ;;  %v2558_v47 = vld [vmem:[%s3324_s0 + $0x1c0] sm:$0xff]   ;;  %v2559_v48 = vld [vmem:[%s3324_s0 + $0x138] sm:$0xff]  }
  0x10   :  { %2436 = vmatprep.subr.bf16.mxu0 %v2516_v6  ;;  %2476 = vmatprep.subr.bf16.mxu1 %v2516_v6  ;;  %v2560_v49 = vld [vmem:[%s3324_s0 + $0x1c8] sm:$0xff]   ;;  %v2561_v50 = vld [vmem:[%s3324_s0 + $0x140] sm:$0xff]   ;;  %v2562_v51 = vld [vmem:[%s3324_s0 + $0x1d0] sm:$0xff]  }
  0x11   :  { %v2563_v52 = vld [vmem:[%s3324_s0 + $0x148] sm:$0xff]   ;;  %v2564_v53 = vld [vmem:[%s3324_s0 + $0x1d8] sm:$0xff]   ;;  %v2565_v54 = vld [vmem:[%s3324_s0 + $0x150] sm:$0xff]  }
  0x12   :  { %2437 = vmatpush3.bf16.msra.mxu0 %v2516_v6  ;;  %2477 = vmatpush3.bf16.msra.mxu1 %v2516_v6  ;;  %v2566_v55 = vld [vmem:[%s3324_s0 + $0x1e0] sm:$0xff]   ;;  %v2567_v56 = vld [vmem:[%s3324_s0 + $0x158] sm:$0xff]   ;;  %v2568_v57 = vld [vmem:[%s3324_s0 + $0x1e8] sm:$0xff]  }
  0x13   :  { %v2569_v58 = vld [vmem:[%s3324_s0 + $0x160] sm:$0xff]   ;;  %v2570_v59 = vld [vmem:[%s3324_s0 + $0x1f0] sm:$0xff]   ;;  %v2571_v60 = vld [vmem:[%s3324_s0 + $0x168] sm:$0xff]  }
  0x14   :  { %v2572_v61 = vld [vmem:[%s3324_s0 + $0x1f8] sm:$0xff]   ;;  %v2573_v62 = vld [vmem:[%s3324_s0 + $0x170] sm:$0xff]   ;;  %v2574_v63 = vld [vmem:[%s3324_s0 + $0x200] sm:$0xff]  }
  0x15   :  { %2363 = vmatmul.mubr.msk.bf16.gmra.mxu0 %vm156_vm2, %v2523_v12  ;;  %2403 = vmatmul.mubr.msk.bf16.gmra.mxu1 %vm156_vm2, %v2524_v13  ;;  %v2575_v0 = vld [vmem:[%s3324_s0 + $0x178] sm:$0xff]   ;;  %v2576_v1 = vld [vmem:[%s3324_s0 + $0x208] sm:$0xff]   ;;  %v2577_v2 = vld [vmem:[%s3324_s0 + $0x180] sm:$0xff]  }
  0x16   :  { %2366 = vmatprep.mubr.msk.bf16.mxu0 %vm156_vm2, %v2525_v14  ;;  %2406 = vmatprep.mubr.msk.bf16.mxu1 %vm156_vm2, %v2526_v15  ;;  %v2578_v3 = vld [vmem:[%s3324_s0 + $0x210] sm:$0xff]   ;;  %v2579_v4 = vld [vmem:[%s3324_s0 + $0x188] sm:$0xff]   ;;  %v2580_v5 = vld [vmem:[%s3324_s0 + $0x218] sm:$0xff]  }
  0x17   :  { %v2581_v6 = vld [vmem:[%s3324_s0 + $0x190] sm:$0xff]   ;;  %v2582_v7 = vld [vmem:[%s3324_s0 + $0x220] sm:$0xff]   ;;  %v2583_v8 = vld [vmem:[%s3324_s0 + $0x198] sm:$0xff]  }
  0x18   :  { %v2584_v9 = vld [vmem:[%s3324_s0 + $0x228] sm:$0xff]   ;;  %v2585_v10 = vld [vmem:[%s3324_s0 + $0x1a0] sm:$0xff]   ;;  %v2586_v11 = vld [vmem:[%s3324_s0 + $0x230] sm:$0xff]  }
  0x19   :  { %v2587_v12 = vld [vmem:[%s3324_s0 + $0x1a8] sm:$0xff]   ;;  %v2588_v13 = vld [vmem:[%s3324_s0 + $0x238] sm:$0xff]  }
  0x1d   :  { %2367 = vmatmul.mubr.msk.bf16.gmra.mxu0 %vm156_vm2, %v2527_v16  ;;  %2407 = vmatmul.mubr.msk.bf16.gmra.mxu1 %vm156_vm2, %v2528_v17 }
  0x1e   :  { %2370 = vmatprep.mubr.msk.bf16.mxu0 %vm156_vm2, %v2529_v18  ;;  %2410 = vmatprep.mubr.msk.bf16.mxu1 %vm156_vm2, %v2530_v19 }
  0x25   :  { %2371 = vmatmul.mubr.msk.bf16.gmra.mxu0 %vm156_vm2, %v2531_v20  ;;  %2411 = vmatmul.mubr.msk.bf16.gmra.mxu1 %vm156_vm2, %v2532_v21 }
  0x26   :  { %2374 = vmatprep.mubr.msk.bf16.mxu0 %vm156_vm2, %v2533_v22  ;;  %2414 = vmatprep.mubr.msk.bf16.mxu1 %vm156_vm2, %v2534_v23 }
  0x2d   :  { %2375 = vmatmul.mubr.msk.bf16.gmra.mxu0 %vm156_vm2, %v2535_v24  ;;  %2415 = vmatmul.mubr.msk.bf16.gmra.mxu1 %vm156_vm2, %v2536_v25 }
  0x2e   :  { %2378 = vmatprep.mubr.msk.bf16.mxu0 %vm156_vm2, %v2537_v26  ;;  %2418 = vmatprep.mubr.msk.bf16.mxu1 %vm156_vm2, %v2538_v27 }
  0x35   :  { %2379 = vmatmul.mubr.msk.bf16.gmra.mxu0 %vm156_vm2, %v2539_v28  ;;  %2419 = vmatmul.mubr.msk.bf16.gmra.mxu1 %vm156_vm2, %v2540_v29 }
  0x36   :  { %2382 = vmatprep.mubr.msk.bf16.mxu0 %vm156_vm2, %v2541_v30  ;;  %2422 = vmatprep.mubr.msk.bf16.mxu1 %vm156_vm2, %v2542_v31 }
  0x3d   :  { %2383 = vmatmul.mubr.msk.bf16.gmra.mxu0 %vm156_vm2, %v2543_v32  ;;  %2423 = vmatmul.mubr.msk.bf16.gmra.mxu1 %vm156_vm2, %v2544_v33 }
  0x3e   :  { %2386 = vmatprep.mubr.msk.bf16.mxu0 %vm156_vm2, %v2545_v34  ;;  %2426 = vmatprep.mubr.msk.bf16.mxu1 %vm156_vm2, %v2546_v35 }
  0x45   :  { %2387 = vmatmul.mubr.msk.bf16.gmra.mxu0 %vm156_vm2, %v2547_v36  ;;  %2427 = vmatmul.mubr.msk.bf16.gmra.mxu1 %vm156_vm2, %v2548_v37 }
  0x46   :  { %2390 = vmatprep.mubr.msk.bf16.mxu0 %vm156_vm2, %v2549_v38  ;;  %2430 = vmatprep.mubr.msk.bf16.mxu1 %vm156_vm2, %v2550_v39 }
  0x4d   :  { %2391 = vmatmul.mubr.msk.bf16.gmra.mxu0 %vm156_vm2, %v2551_v40  ;;  %2431 = vmatmul.mubr.msk.bf16.gmra.mxu1 %vm156_vm2, %v2552_v41 }
  0x4e   :  { %2438 = vmatprep.mubr.msk.bf16.mxu0 %vm156_vm2, %v2553_v42  ;;  %2478 = vmatprep.mubr.msk.bf16.mxu1 %vm156_vm2, %v2554_v43 }
  0x55   :  { %2439 = vmatmul.mubr.msk.bf16.vlgmr.msra.gmra.mxu0 %vm156_vm2, %v2555_v44  ;;  %2479 = vmatmul.mubr.msk.bf16.vlgmr.msra.gmra.mxu1 %vm156_vm2, %v2556_v45 }
  0x56   :  { %2442 = vmatprep.mubr.msk.bf16.mxu0 %vm156_vm2, %v2557_v46  ;;  %2482 = vmatprep.mubr.msk.bf16.mxu1 %vm156_vm2, %v2558_v47 }
  0x5d   :  { %2443 = vmatmul.mubr.msk.bf16.gmra.mxu0 %vm156_vm2, %v2559_v48  ;;  %2483 = vmatmul.mubr.msk.bf16.gmra.mxu1 %vm156_vm2, %v2560_v49 }
  0x5e   :  { %2446 = vmatprep.mubr.msk.bf16.mxu0 %vm156_vm2, %v2561_v50  ;;  %2486 = vmatprep.mubr.msk.bf16.mxu1 %vm156_vm2, %v2562_v51 }
  0x65   :  { %2447 = vmatmul.mubr.msk.bf16.gmra.mxu0 %vm156_vm2, %v2563_v52  ;;  %2487 = vmatmul.mubr.msk.bf16.gmra.mxu1 %vm156_vm2, %v2564_v53 }
  0x66   :  { %2450 = vmatprep.mubr.msk.bf16.mxu0 %vm156_vm2, %v2565_v54  ;;  %2490 = vmatprep.mubr.msk.bf16.mxu1 %vm156_vm2, %v2566_v55 }
  0x6d   :  { %2451 = vmatmul.mubr.msk.bf16.gmra.mxu0 %vm156_vm2, %v2567_v56  ;;  %2491 = vmatmul.mubr.msk.bf16.gmra.mxu1 %vm156_vm2, %v2568_v57 }
  0x6e   :  { %2454 = vmatprep.mubr.msk.bf16.mxu0 %vm156_vm2, %v2569_v58  ;;  %2494 = vmatprep.mubr.msk.bf16.mxu1 %vm156_vm2, %v2570_v59 }
  0x75   :  { %2455 = vmatmul.mubr.msk.bf16.gmra.mxu0 %vm156_vm2, %v2571_v60  ;;  %2495 = vmatmul.mubr.msk.bf16.gmra.mxu1 %vm156_vm2, %v2572_v61 }
  0x76   :  { %2458 = vmatprep.mubr.msk.bf16.mxu0 %vm156_vm2, %v2573_v62  ;;  %2498 = vmatprep.mubr.msk.bf16.mxu1 %vm156_vm2, %v2574_v63 }
  0x7d   :  { %2459 = vmatmul.mubr.msk.bf16.gmra.mxu0 %vm156_vm2, %v2575_v0  ;;  %2499 = vmatmul.mubr.msk.bf16.gmra.mxu1 %vm156_vm2, %v2576_v1 }
  0x7e   :  { %2462 = vmatprep.mubr.msk.bf16.mxu0 %vm156_vm2, %v2577_v2  ;;  %2502 = vmatprep.mubr.msk.bf16.mxu1 %vm156_vm2, %v2578_v3 }
  0x85   :  { %2463 = vmatmul.mubr.msk.bf16.gmra.mxu0 %vm156_vm2, %v2579_v4  ;;  %2503 = vmatmul.mubr.msk.bf16.gmra.mxu1 %vm156_vm2, %v2580_v5 }
  0x86   :  { %2466 = vmatprep.mubr.msk.bf16.mxu0 %vm156_vm2, %v2581_v6  ;;  %2506 = vmatprep.mubr.msk.bf16.mxu1 %vm156_vm2, %v2582_v7 }
  0x8d   :  { %2467 = vmatmul.mubr.msk.bf16.gmra.mxu0 %vm156_vm2, %v2583_v8  ;;  %2507 = vmatmul.mubr.msk.bf16.gmra.mxu1 %vm156_vm2, %v2584_v9 }
  0x8e   :  { %2470 = vmatprep.mubr.msk.bf16.mxu0 %vm156_vm2, %v2585_v10  ;;  %2510 = vmatprep.mubr.msk.bf16.mxu1 %vm156_vm2, %v2586_v11 }
  0x95   :  { %2471 = vmatmul.mubr.msk.bf16.gmra.mxu0 %vm156_vm2, %v2587_v12  ;;  %2511 = vmatmul.mubr.msk.bf16.gmra.mxu1 %vm156_vm2, %v2588_v13 }
  0xcd   :  { %v2904_v14 = vpop.f32.mrf.mxu0  ;;  %v2906_v15 = vpop.f32.mrf.mxu1 }
  0xcf   :  { %v2910_v17 = vpop.f32.mrf.mxu0  ;;  %v2912_v18 = vpop.f32.mrf.mxu1 }
  0xd1   :  { %v2916_v20 = vpop.f32.mrf.mxu0  ;;  %v2918_v21 = vpop.f32.mrf.mxu1 }
  0xd3   :  { %v2922_v23 = vpop.f32.mrf.mxu0  ;;  %v2924_v24 = vpop.f32.mrf.mxu1 }
  0xd5   :  { %v2928_v26 = vpop.f32.mrf.mxu0  ;;  %v2930_v27 = vpop.f32.mrf.mxu1 }
  0xd7   :  { %v2934_v29 = vpop.f32.mrf.mxu0  ;;  %v2936_v30 = vpop.f32.mrf.mxu1 }
  0xd9   :  { %v2940_v32 = vpop.f32.mrf.mxu0  ;;  %v2942_v33 = vpop.f32.mrf.mxu1 }
  0xdb   :  { %v2946_v35 = vpop.f32.mrf.mxu0  ;;  %v2948_v36 = vpop.f32.mrf.mxu1 }
  0xdd   :  { %v2952_v38 = vpop.f32.mrf.mxu0  ;;  %v2954_v39 = vpop.f32.mrf.mxu1 }
  0xdf   :  { %v2958_v41 = vpop.f32.mrf.mxu0  ;;  %v2960_v42 = vpop.f32.mrf.mxu1 }
  0xe1   :  { %v2964_v44 = vpop.f32.mrf.mxu0  ;;  %v2966_v45 = vpop.f32.mrf.mxu1 }
  0xe3   :  { %v2970_v47 = vpop.f32.mrf.mxu0  ;;  %v2972_v48 = vpop.f32.mrf.mxu1 }
  0xe5   :  { %v2976_v50 = vpop.f32.mrf.mxu0  ;;  %v2978_v51 = vpop.f32.mrf.mxu1 }
  0xe7   :  { %v2982_v53 = vpop.f32.mrf.mxu0  ;;  %v2984_v54 = vpop.f32.mrf.mxu1 }
  0xe9   :  { %v2988_v56 = vpop.f32.mrf.mxu0  ;;  %v2990_v57 = vpop.f32.mrf.mxu1 }
  0xeb   :  { %v2994_v59 = vpop.f32.mrf.mxu0  ;;  %v2996_v60 = vpop.f32.mrf.mxu1 }
  0xed   :  { %v3000_v62 = vpop.f32.mrf.mxu0  ;;  %v3002_v63 = vpop.f32.mrf.mxu1 }
  0xef   :  { %v3006_v1 = vpop.f32.mrf.mxu0  ;;  %v3008_v2 = vpop.f32.mrf.mxu1 }
  0xf1   :  { %v3012_v4 = vpop.f32.mrf.mxu0  ;;  %v3014_v5 = vpop.f32.mrf.mxu1 }
  0xf3   :  { %v3018_v7 = vpop.f32.mrf.mxu0  ;;  %v3020_v8 = vpop.f32.mrf.mxu1 }
  0xf5   :  { %v3024_v10 = vpop.f32.mrf.mxu0  ;;  %v3026_v11 = vpop.f32.mrf.mxu1 }
  0xf7   :  { %v3030_v13 = vpop.f32.mrf.mxu0  ;;  %v3032_v3 = vpop.f32.mrf.mxu1 }
  0xf9   :  { %v3036_v0 = vpop.f32.mrf.mxu0  ;;  %v3038_v61 = vpop.f32.mrf.mxu1 }
  0xfb   :  { %v3042_v58 = vpop.f32.mrf.mxu0  ;;  %v3044_v55 = vpop.f32.mrf.mxu1 }
  0xfd   :  { %v3048_v52 = vpop.f32.mrf.mxu0  ;;  %v3050_v49 = vpop.f32.mrf.mxu1 }
  0xfe   :  { %3350 = vst [vmem:[#allocation2_spill] sm:$0xff] %v3050_v49 }
  0xff   :  { %v3054_v46 = vpop.f32.mrf.mxu0  ;;  %v3056_v43 = vpop.f32.mrf.mxu1 }
 0x100   :  { %3351 = vst [vmem:[#allocation3_spill] sm:$0xff] %v3054_v46  ;;  %3352 = vst [vmem:[#allocation4_spill] sm:$0xff] %v3056_v43  ;;  %v3374_v46 = vmax.f32 %v2910_v17, %v2912_v18  ;;  %v3376_v17 = vmax.f32 %v2922_v23, %v2924_v24  ;;  %v3378_v23 = vmax.f32 %v2934_v29, %v2936_v30 }
 0x101   :  { %v3060_v40 = vpop.f32.mrf.mxu0  ;;  %v3062_v37 = vpop.f32.mrf.mxu1  ;;  %v3380_v29 = vmax.f32 %v2946_v35, %v2948_v36 }
 0x102   :  { %3353 = vst [vmem:[#allocation5_spill] sm:$0xff] %v3060_v40  ;;  %3354 = vst [vmem:[#allocation6_spill] sm:$0xff] %v3062_v37  ;;  %v3373_v40 = vmax.f32 %v2904_v14, %v2906_v15 }
 0x103   :  { %v3066_v34 = vpop.f32.mrf.mxu0  ;;  %v3068_v31 = vpop.f32.mrf.mxu1 }
 0x104   :  { %3355 = vst [vmem:[#allocation7_spill] sm:$0xff] %v3066_v34  ;;  %3356 = vst [vmem:[#allocation8_spill] sm:$0xff] %v3068_v31 }
 0x105   :  { %v3072_v28 = vpop.f32.mrf.mxu0  ;;  %v3074_v25 = vpop.f32.mrf.mxu1 }
 0x106   :  { %3357 = vst [vmem:[#allocation9_spill] sm:$0xff] %v3072_v28  ;;  %3358 = vst [vmem:[#allocation10_spill] sm:$0xff] %v3074_v25 }
 0x107   :  { %v3078_v22 = vpop.f32.mrf.mxu0  ;;  %v3080_v19 = vpop.f32.mrf.mxu1 }
 0x108   :  { %3359 = vst [vmem:[#allocation11_spill] sm:$0xff] %v3078_v22  ;;  %3360 = vst [vmem:[#allocation12_spill] sm:$0xff] %v3080_v19 }
 0x109   :  { %v3084_v16 = vpop.f32.mrf.mxu0  ;;  %v3086_v37 = vpop.f32.mrf.mxu1 }
 0x10a   :  { %3361 = vst [vmem:[#allocation13_spill] sm:$0xff] %v3084_v16  ;;  %3362 = vst [vmem:[#allocation14_spill] sm:$0xff] %v3086_v37 }
 0x10b   :  { %v3090_v31 = vpop.f32.mrf.mxu0  ;;  %v3092_v34 = vpop.f32.mrf.mxu1 }
 0x10c   :  { %3363 = vst [vmem:[#allocation15_spill] sm:$0xff] %v3090_v31  ;;  %3364 = vst [vmem:[#allocation16_spill] sm:$0xff] %v3092_v34 }
 0x10d   :  { %v3096_v25 = vpop.f32.mrf.mxu0  ;;  %v3098_v28 = vpop.f32.mrf.mxu1 }
 0x10e   :  { %3365 = vst [vmem:[#allocation17_spill] sm:$0xff] %v3096_v25  ;;  %3366 = vst [vmem:[#allocation18_spill] sm:$0xff] %v3098_v28 }
 0x10f   :  { %v3102_v19 = vpop.f32.mrf.mxu0  ;;  %v3104_v22 = vpop.f32.mrf.mxu1 }
 0x110   :  { %3367 = vst [vmem:[#allocation19_spill] sm:$0xff] %v3102_v19  ;;  %3368 = vst [vmem:[#allocation20_spill] sm:$0xff] %v3104_v22 }
 0x111   :  { %v3108_v37 = vpop.f32.mrf.mxu0  ;;  %v3110_v16 = vpop.f32.mrf.mxu1 }
 0x112   :  { %3369 = vst [vmem:[#allocation21_spill] sm:$0xff] %v3108_v37  ;;  %3370 = vst [vmem:[#allocation22_spill] sm:$0xff] %v3110_v16  ;;  %v3129_v16 = vld [vmem:[%s3325_s2] ss:$0 sm:$0xff] }
 0x113   :  { %v3114_v34 = vpop.f32.mrf.mxu0  ;;  %v3116_v31 = vpop.f32.mrf.mxu1 }
 0x114   :  { %3371 = vst [vmem:[#allocation23_spill] sm:$0xff] %v3114_v34  ;;  %3372 = vst [vmem:[#allocation24_spill] sm:$0xff] %v3116_v31  ;;  %v3375_v34 = vmax.f32 %v2916_v20, %v2918_v21  ;;  %v3377_v20 = vmax.f32 %v2928_v26, %v2930_v27  ;;  %v3379_v26 = vmax.f32 %v2940_v32, %v2942_v33 }
 0x115   :  { %v2440_v28 = vpop.f32.mrf.mxu0  ;;  %v2480_v25 = vpop.f32.mrf.mxu1 }
 0x116   :  { %v1149_v6 = vmax.f32 %v3373_v40, %v2440_v28 }
 0x117   :  { %v1004_v22 = vpop.f32.mrf.mxu0  ;;  %v1398_v19 = vpop.f32.mrf.mxu1 }
 0x118   :  { %v1543_v43 = vmax.f32 %v1149_v6, %v2480_v25  ;;  %v1147_v9 = vmax.f32 %v3374_v46, %v1004_v22 }
 0x119   :  { %v2441_v37 = vpop.f32.mrf.mxu0  ;;  %v2481_v12 = vpop.f32.mrf.mxu1 }
 0x11a   :  { %v1541_v31 = vmax.f32 %v1147_v9, %v1398_v19  ;;  %v1150_v14 = vmax.f32 %v3375_v34, %v2441_v37  ;;  %v1586_v25 = vadd.f32 %v3129_v16, %v1543_v43 }
 0x11b   :  { %v1007_v15 = vpop.f32.mrf.mxu0  ;;  %v1401_v28 = vpop.f32.mrf.mxu1 }
 0x11c   :  { %v1544_v40 = vmax.f32 %v1150_v14, %v2481_v12  ;;  %v1148_v18 = vmax.f32 %v3376_v17, %v1007_v15  ;;  %v1584_v6 = vadd.f32 %v3129_v16, %v1541_v31  ;;  %v1622_v9 = vmax.f32 %v1586_v25, 0.0 }
 0x11d   :  { %v2444_v22 = vpop.f32.mrf.mxu0  ;;  %v2484_v46 = vpop.f32.mrf.mxu1 }
 0x11e   :  { %v1587_v49 = vadd.f32 %v3129_v16, %v1544_v40  ;;  %v1542_v19 = vmax.f32 %v1148_v18, %v1401_v28  ;;  %v1153_v21 = vmax.f32 %v3377_v20, %v2444_v22  ;;  %v1620_v17 = vmax.f32 %v1584_v6, 0.0 }
 0x11f   :  { %v1020_v34 = vpop.f32.mrf.mxu0  ;;  %v1414_v37 = vpop.f32.mrf.mxu1 }
 0x120   :  { %v1623_v43 = vmax.f32 %v1587_v49, 0.0  ;;  %v1585_v12 = vadd.f32 %v3129_v16, %v1542_v19  ;;  %v1151_v24 = vmax.f32 %v3378_v23, %v1020_v34  ;;  %v1547_v14 = vmax.f32 %v1153_v21, %v2484_v46 }
 0x121   :  { %v2445_v15 = vpop.f32.mrf.mxu0  ;;  %v2485_v31 = vpop.f32.mrf.mxu1  ;;  %v3381_v21 = vmax.f32 %v2952_v38, %v2954_v39  ;;  %v3383_v38 = vmax.f32 %v2964_v44, %v2966_v45  ;;  %v3385_v45 = vmax.f32 %v2976_v50, %v2978_v51  ;;  %v3387_v50 = vmax.f32 %v2988_v56, %v2990_v57 }
 0x122   :  { %v2175_v40 = vpack.c.bf16 %v1623_v43, %v1622_v9  ;;  %v1621_v28 = vmax.f32 %v1585_v12, 0.0  ;;  %v1545_v18 = vmax.f32 %v1151_v24, %v1414_v37  ;;  %v1154_v27 = vmax.f32 %v3379_v26, %v2445_v15 }
 0x123   :  { %v1023_v22 = vpop.f32.mrf.mxu0  ;;  %v1417_v25 = vpop.f32.mrf.mxu1  ;;  %v1590_v46 = vadd.f32 %v3129_v16, %v1547_v14  ;;  %v3382_v12 = vmax.f32 %v2958_v41, %v2960_v42  ;;  %v3384_v41 = vmax.f32 %v2970_v47, %v2972_v48 }
 0x124   :  { %2257 = vst [vmem:[%s3326_s3 + $0x8] sm:$0xff] %v2175_v40   ;;  %v2170_v49 = vpack.c.bf16 %v1621_v28, %v1620_v17  ;;  %v1152_v30 = vmax.f32 %v3380_v29, %v1023_v22  ;;  %v1548_v6 = vmax.f32 %v1154_v27, %v2485_v31  ;;  %v1588_v32 = vadd.f32 %v3129_v16, %v1545_v18 }
 0x125   :  { %v2448_v19 = vpop.f32.mrf.mxu0  ;;  %v2488_v20 = vpop.f32.mrf.mxu1  ;;  %v1626_v24 = vmax.f32 %v1590_v46, 0.0 }
 0x126   :  { %2171 = vst [vmem:[%s3326_s3] sm:$0xff] %v2170_v49   ;;  %v1546_v33 = vmax.f32 %v1152_v30, %v1417_v25  ;;  %v1157_v34 = vmax.f32 %v3381_v21, %v2448_v19  ;;  %v1591_v37 = vadd.f32 %v3129_v16, %v1548_v6  ;;  %v1624_v17 = vmax.f32 %v1588_v32, 0.0 }
 0x127   :  { %v1036_v35 = vpop.f32.mrf.mxu0  ;;  %v1430_v36 = vpop.f32.mrf.mxu1  ;;  %v3386_v21 = vmax.f32 %v2982_v53, %v2984_v54 }
 0x128   :  { %v1589_v9 = vadd.f32 %v3129_v16, %v1546_v33  ;;  %v1551_v43 = vmax.f32 %v1157_v34, %v2488_v20  ;;  %v1155_v23 = vmax.f32 %v3382_v12, %v1036_v35  ;;  %v1627_v14 = vmax.f32 %v1591_v37, 0.0 }
 0x129   :  { %v2449_v15 = vpop.f32.mrf.mxu0  ;;  %v2489_v31 = vpop.f32.mrf.mxu1 }
 0x12a   :  { %v1625_v40 = vmax.f32 %v1589_v9, 0.0  ;;  %v1158_v39 = vmax.f32 %v3383_v38, %v2449_v15  ;;  %v2185_v28 = vpack.c.bf16 %v1627_v14, %v1626_v24  ;;  %v1549_v18 = vmax.f32 %v1155_v23, %v1430_v36 }
 0x12b   :  { %v1039_v26 = vpop.f32.mrf.mxu0  ;;  %v1433_v27 = vpop.f32.mrf.mxu1  ;;  %v1594_v25 = vadd.f32 %v3129_v16, %v1551_v43  ;;  %v3388_v15 = vmax.f32 %v2994_v59, %v2996_v60 }
 0x12c   :  { %v2180_v22 = vpack.c.bf16 %v1625_v40, %v1624_v17  ;;  %v1552_v49 = vmax.f32 %v1158_v39, %v2489_v31  ;;  %2259 = vst [vmem:[%s3326_s3 + $0x18] sm:$0xff] %v2185_v28   ;;  %v1156_v42 = vmax.f32 %v3384_v41, %v1039_v26  ;;  %v1592_v6 = vadd.f32 %v3129_v16, %v1549_v18 }
 0x12d   :  { %v2452_v29 = vpop.f32.mrf.mxu0  ;;  %v2492_v30 = vpop.f32.mrf.mxu1  ;;  %v1630_v33 = vmax.f32 %v1594_v25, 0.0  ;;  %v3389_v28 = vmax.f32 %v3000_v62, %v3002_v63  ;;  %v3390_v25 = vmax.f32 %v3006_v1, %v3008_v2  ;;  %v3392_v1 = vmax.f32 %v3018_v7, %v3020_v8 }
 0x12e   :  { %2258 = vst [vmem:[%s3326_s3 + $0x10] sm:$0xff] %v2180_v22   ;;  %v1595_v44 = vadd.f32 %v3129_v16, %v1552_v49  ;;  %v1161_v46 = vmax.f32 %v3385_v45, %v2452_v29  ;;  %v1550_v19 = vmax.f32 %v1156_v42, %v1433_v27  ;;  %v1628_v12 = vmax.f32 %v1592_v6, 0.0 }
 0x12f   :  { %v1052_v20 = vpop.f32.mrf.mxu0  ;;  %v1446_v32 = vpop.f32.mrf.mxu1  ;;  %v3391_v45 = vmax.f32 %v3012_v4, %v3014_v5 }
 0x130   :  { %v1631_v47 = vmax.f32 %v1595_v44, 0.0  ;;  %v1555_v48 = vmax.f32 %v1161_v46, %v2492_v30  ;;  %v1159_v34 = vmax.f32 %v3386_v21, %v1052_v20  ;;  %v1593_v37 = vadd.f32 %v3129_v16, %v1550_v19 }
 0x131   :  { %v2453_v35 = vpop.f32.mrf.mxu0  ;;  %v2493_v36 = vpop.f32.mrf.mxu1  ;;  %v3393_v21 = vmax.f32 %v3024_v10, %v3026_v11  ;;  %v3395_v10 = vmax.f32 %v3036_v0, %v3038_v61  ;;  %v3397_v0 = vld [vmem:[#allocation2_spill] sm:$0xff] }
 0x132   :  { %v2195_v9 = vpack.c.bf16 %v1631_v47, %v1630_v33  ;;  %v1553_v43 = vmax.f32 %v1159_v34, %v1446_v32  ;;  %v1162_v51 = vmax.f32 %v3387_v50, %v2453_v35  ;;  %v1629_v23 = vmax.f32 %v1593_v37, 0.0 }
 0x133   :  { %v1055_v24 = vpop.f32.mrf.mxu0  ;;  %v1449_v14 = vpop.f32.mrf.mxu1  ;;  %v1598_v53 = vadd.f32 %v3129_v16, %v1555_v48 }
 0x134   :  { %2261 = vst [vmem:[%s3326_s3 + $0x28] sm:$0xff] %v2195_v9   ;;  %v1556_v54 = vmax.f32 %v1162_v51, %v2493_v36  ;;  %v1160_v31 = vmax.f32 %v3388_v15, %v1055_v24  ;;  %v2190_v17 = vpack.c.bf16 %v1629_v23, %v1628_v12  ;;  %v1596_v56 = vadd.f32 %v3129_v16, %v1553_v43 }
 0x135   :  { %v2456_v40 = vpop.f32.mrf.mxu0  ;;  %v2496_v38 = vpop.f32.mrf.mxu1  ;;  %v1634_v59 = vmax.f32 %v1598_v53, 0.0  ;;  %v3394_v9 = vmax.f32 %v3030_v13, %v3032_v3  ;;  %v3396_v3 = vmax.f32 %v3042_v58, %v3044_v55 }
 0x136   :  { %v1599_v57 = vadd.f32 %v3129_v16, %v1556_v54  ;;  %v1554_v39 = vmax.f32 %v1160_v31, %v1449_v14  ;;  %v1165_v18 = vmax.f32 %v3389_v28, %v2456_v40  ;;  %2260 = vst [vmem:[%s3326_s3 + $0x20] sm:$0xff] %v2190_v17   ;;  %v1632_v30 = vmax.f32 %v1596_v56, 0.0 }
 0x137   :  { %v1068_v26 = vpop.f32.mrf.mxu0  ;;  %v1462_v27 = vpop.f32.mrf.mxu1 }
 0x138   :  { %v1635_v60 = vmax.f32 %v1599_v57, 0.0  ;;  %v1597_v22 = vadd.f32 %v3129_v16, %v1554_v39  ;;  %v1163_v49 = vmax.f32 %v3390_v25, %v1068_v26  ;;  %v1559_v41 = vmax.f32 %v1165_v18, %v2496_v38  ;;  %v3400_v25 = vld [vmem:[#allocation4_spill] sm:$0xff] }
 0x139   :  { %v2457_v42 = vpop.f32.mrf.mxu0  ;;  %v2497_v29 = vpop.f32.mrf.mxu1  ;;  %v3398_v39 = vmax.f32 %v3048_v52, %v3397_v0  ;;  %v3402_v52 = vld [vmem:[#allocation5_spill] sm:$0xff] }
 0x13a   :  { %v2205_v62 = vpack.c.bf16 %v1635_v60, %v1634_v59  ;;  %v1633_v63 = vmax.f32 %v1597_v22, 0.0  ;;  %v1557_v44 = vmax.f32 %v1163_v49, %v1462_v27  ;;  %v1166_v46 = vmax.f32 %v3391_v45, %v2457_v42  ;;  %v3399_v22 = vld [vmem:[#allocation3_spill] sm:$0xff] }
 0x13b   :  { %v1071_v6 = vpop.f32.mrf.mxu0  ;;  %v1465_v19 = vpop.f32.mrf.mxu1  ;;  %v1602_v32 = vadd.f32 %v3129_v16, %v1559_v41  ;;  %v3401_v49 = vmax.f32 %v3399_v22, %v3400_v25 }
 0x13c   :  { %2263 = vst [vmem:[%s3326_s3 + $0x38] sm:$0xff] %v2205_v62   ;;  %v2200_v20 = vpack.c.bf16 %v1633_v63, %v1632_v30  ;;  %v1164_v2 = vmax.f32 %v3392_v1, %v1071_v6  ;;  %v1560_v33 = vmax.f32 %v1166_v46, %v2497_v29  ;;  %v1600_v4 = vadd.f32 %v3129_v16, %v1557_v44  ;;  %v3403_v44 = vld [vmem:[#allocation6_spill] sm:$0xff] }
 0x13d   :  { %v2460_v47 = vpop.f32.mrf.mxu0  ;;  %v2500_v48 = vpop.f32.mrf.mxu1  ;;  %v1638_v50 = vmax.f32 %v1602_v32, 0.0  ;;  %v3404_v45 = vmax.f32 %v3402_v52, %v3403_v44 }
 0x13e   :  { %2262 = vst [vmem:[%s3326_s3 + $0x30] sm:$0xff] %v2200_v20   ;;  %v1558_v5 = vmax.f32 %v1164_v2, %v1465_v19  ;;  %v1169_v34 = vmax.f32 %v3393_v21, %v2460_v47  ;;  %v1603_v37 = vadd.f32 %v3129_v16, %v1560_v33  ;;  %v1636_v24 = vmax.f32 %v1600_v4, 0.0  ;;  %v3405_v33 = vld [vmem:[#allocation7_spill] sm:$0xff]  ;;  %v3406_v47 = vld [vmem:[#allocation8_spill] sm:$0xff] }
 0x13f   :  { %v1084_v7 = vpop.f32.mrf.mxu0  ;;  %v1478_v8 = vpop.f32.mrf.mxu1 }
 0x140   :  { %v1601_v35 = vadd.f32 %v3129_v16, %v1558_v5  ;;  %v1563_v36 = vmax.f32 %v1169_v34, %v2500_v48  ;;  %v1167_v43 = vmax.f32 %v3394_v9, %v1084_v7  ;;  %v1639_v51 = vmax.f32 %v1603_v37, 0.0 }
 0x141   :  { %v2461_v12 = vpop.f32.mrf.mxu0  ;;  %v2501_v23 = vpop.f32.mrf.mxu1  ;;  %v3407_v48 = vmax.f32 %v3405_v33, %v3406_v47 }
 0x142   :  { %v1637_v14 = vmax.f32 %v1601_v35, 0.0  ;;  %v1170_v11 = vmax.f32 %v3395_v10, %v2461_v12  ;;  %v2215_v53 = vpack.c.bf16 %v1639_v51, %v1638_v50  ;;  %v1561_v54 = vmax.f32 %v1167_v43, %v1478_v8  ;;  %v3408_v35 = vld [vmem:[#allocation9_spill] sm:$0xff]  ;;  %v3412_v10 = vld [vmem:[#allocation12_spill] sm:$0xff] }
 0x143   :  { %v1087_v15 = vpop.f32.mrf.mxu0  ;;  %v1481_v31 = vpop.f32.mrf.mxu1  ;;  %v1606_v40 = vadd.f32 %v3129_v16, %v1563_v36  ;;  %v3409_v36 = vld [vmem:[#allocation10_spill] sm:$0xff] }
 0x144   :  { %v2210_v17 = vpack.c.bf16 %v1637_v14, %v1636_v24  ;;  %v1564_v38 = vmax.f32 %v1170_v11, %v2501_v23  ;;  %2265 = vst [vmem:[%s3326_s3 + $0x48] sm:$0xff] %v2215_v53   ;;  %v1168_v13 = vmax.f32 %v3396_v3, %v1087_v15  ;;  %v1604_v18 = vadd.f32 %v3129_v16, %v1561_v54  ;;  %v3411_v14 = vld [vmem:[#allocation11_spill] sm:$0xff] }
 0x145   :  { %v2464_v56 = vpop.f32.mrf.mxu0  ;;  %v2504_v57 = vpop.f32.mrf.mxu1  ;;  %v1642_v60 = vmax.f32 %v1606_v40, 0.0  ;;  %v3410_v9 = vmax.f32 %v3408_v35, %v3409_v36  ;;  %v3413_v11 = vmax.f32 %v3411_v14, %v3412_v10 }
 0x146   :  { %2264 = vst [vmem:[%s3326_s3 + $0x40] sm:$0xff] %v2210_v17   ;;  %v1607_v61 = vadd.f32 %v3129_v16, %v1564_v38  ;;  %v1173_v28 = vmax.f32 %v3398_v39, %v2464_v56  ;;  %v1562_v26 = vmax.f32 %v1168_v13, %v1481_v31  ;;  %v1640_v6 = vmax.f32 %v1604_v18, 0.0  ;;  %v3414_v13 = vld [vmem:[#allocation13_spill] sm:$0xff]  ;;  %v3415_v56 = vld [vmem:[#allocation14_spill] sm:$0xff]  ;;  %v3417_v18 = vld [vmem:[#allocation15_spill] sm:$0xff] }
 0x147   :  { %v1100_v27 = vpop.f32.mrf.mxu0  ;;  %v1494_v59 = vpop.f32.mrf.mxu1 }
 0x148   :  { %v1643_v55 = vmax.f32 %v1607_v61, 0.0  ;;  %v1567_v58 = vmax.f32 %v1173_v28, %v2504_v57  ;;  %v1171_v41 = vmax.f32 %v3401_v49, %v1100_v27  ;;  %v1605_v42 = vadd.f32 %v3129_v16, %v1562_v26  ;;  %v3418_v26 = vld [vmem:[#allocation16_spill] sm:$0xff] }
 0x149   :  { %v2465_v29 = vpop.f32.mrf.mxu0  ;;  %v2505_v30 = vpop.f32.mrf.mxu1  ;;  %v3416_v57 = vmax.f32 %v3414_v13, %v3415_v56  ;;  %v3419_v27 = vmax.f32 %v3417_v18, %v3418_v26 }
 0x14a   :  { %v2225_v62 = vpack.c.bf16 %v1643_v55, %v1642_v60  ;;  %v1565_v63 = vmax.f32 %v1171_v41, %v1494_v59  ;;  %v1174_v46 = vmax.f32 %v3404_v45, %v2465_v29  ;;  %v1641_v19 = vmax.f32 %v1605_v42, 0.0  ;;  %v3420_v41 = vld [vmem:[#allocation17_spill] sm:$0xff]  ;;  %v3421_v42 = vld [vmem:[#allocation18_spill] sm:$0xff] }
 0x14b   :  { %v1103_v20 = vpop.f32.mrf.mxu0  ;;  %v1497_v1 = vpop.f32.mrf.mxu1  ;;  %v1610_v2 = vadd.f32 %v3129_v16, %v1567_v58  ;;  %v3422_v29 = vmax.f32 %v3420_v41, %v3421_v42 }
 0x14c   :  { %2267 = vst [vmem:[%s3326_s3 + $0x58] sm:$0xff] %v2225_v62   ;;  %v1568_v32 = vmax.f32 %v1174_v46, %v2505_v30  ;;  %v1172_v4 = vmax.f32 %v3407_v48, %v1103_v20  ;;  %v2220_v5 = vpack.c.bf16 %v1641_v19, %v1640_v6  ;;  %v1608_v37 = vadd.f32 %v3129_v16, %v1565_v63  ;;  %v3423_v46 = vld [vmem:[#allocation19_spill] sm:$0xff]  ;;  %v3424_v6 = vld [vmem:[#allocation20_spill] sm:$0xff]  ;;  %v3426_v48 = vld [vmem:[#allocation21_spill] sm:$0xff] }
 0x14d   :  { %v2468_v21 = vpop.f32.mrf.mxu0  ;;  %v2508_v34 = vpop.f32.mrf.mxu1  ;;  %v1646_v12 = vmax.f32 %v1610_v2, 0.0  ;;  %v3425_v19 = vmax.f32 %v3423_v46, %v3424_v6 }
 0x14e   :  { %v1611_v7 = vadd.f32 %v3129_v16, %v1568_v32  ;;  %v1566_v8 = vmax.f32 %v1172_v4, %v1497_v1  ;;  %v1177_v43 = vmax.f32 %v3410_v9, %v2468_v21  ;;  %2266 = vst [vmem:[%s3326_s3 + $0x50] sm:$0xff] %v2220_v5   ;;  %v1644_v17 = vmax.f32 %v1608_v37, 0.0  ;;  %v3427_v4 = vld [vmem:[#allocation22_spill] sm:$0xff] }
 0x14f   :  { %v1116_v50 = vpop.f32.mrf.mxu0  ;;  %v1510_v51 = vpop.f32.mrf.mxu1  ;;  %v3428_v5 = vmax.f32 %v3426_v48, %v3427_v4 }
 0x150   :  { %v1647_v23 = vmax.f32 %v1611_v7, 0.0  ;;  %v1609_v24 = vadd.f32 %v3129_v16, %v1566_v8  ;;  %v1175_v53 = vmax.f32 %v3413_v11, %v1116_v50  ;;  %v1571_v54 = vmax.f32 %v1177_v43, %v2508_v34  ;;  %v3429_v43 = vld [vmem:[#allocation23_spill] sm:$0xff]  ;;  %v3430_v50 = vld [vmem:[#allocation24_spill] sm:$0xff] }
 0x151   :  { %v2469_v15 = vpop.f32.mrf.mxu0  ;;  %v2509_v31 = vpop.f32.mrf.mxu1 }
 0x152   :  { %v2235_v40 = vpack.c.bf16 %v1647_v23, %v1646_v12  ;;  %v1645_v38 = vmax.f32 %v1609_v24, 0.0  ;;  %v1569_v3 = vmax.f32 %v1175_v53, %v1510_v51  ;;  %v1178_v61 = vmax.f32 %v3416_v57, %v2469_v15 }
 0x153   :  { %v1119_v0 = vpop.f32.mrf.mxu0  ;;  %v1513_v39 = vpop.f32.mrf.mxu1  ;;  %v1614_v60 = vadd.f32 %v3129_v16, %v1571_v54  ;;  %v3431_v51 = vmax.f32 %v3429_v43, %v3430_v50 }
 0x154   :  { %2269 = vst [vmem:[%s3326_s3 + $0x68] sm:$0xff] %v2235_v40   ;;  %v2230_v28 = vpack.c.bf16 %v1645_v38, %v1644_v17  ;;  %v1176_v59 = vmax.f32 %v3419_v27, %v1119_v0  ;;  %v1572_v55 = vmax.f32 %v1178_v61, %v2509_v31  ;;  %v1612_v25 = vadd.f32 %v3129_v16, %v1569_v3 }
 0x155   :  { %v2472_v58 = vpop.f32.mrf.mxu0  ;;  %v2512_v22 = vpop.f32.mrf.mxu1  ;;  %v1650_v1 = vmax.f32 %v1614_v60, 0.0 }
 0x156   :  { %2268 = vst [vmem:[%s3326_s3 + $0x60] sm:$0xff] %v2230_v28   ;;  %v1570_v49 = vmax.f32 %v1176_v59, %v1513_v39  ;;  %v1181_v30 = vmax.f32 %v3422_v29, %v2472_v58  ;;  %v1615_v62 = vadd.f32 %v3129_v16, %v1572_v55  ;;  %v1648_v33 = vmax.f32 %v1612_v25, 0.0 }
 0x157   :  { %v1132_v63 = vpop.f32.mrf.mxu0  ;;  %v1526_v52 = vpop.f32.mrf.mxu1 }
 0x158   :  { %v1613_v44 = vadd.f32 %v3129_v16, %v1570_v49  ;;  %v1575_v45 = vmax.f32 %v1181_v30, %v2512_v22  ;;  %v1179_v20 = vmax.f32 %v3425_v19, %v1132_v63  ;;  %v1651_v2 = vmax.f32 %v1615_v62, 0.0 }
 0x159   :  { %v2473_v32 = vpop.f32.mrf.mxu0  ;;  %v2513_v34 = vpop.f32.mrf.mxu1 }
 0x15a   :  { %v1649_v47 = vmax.f32 %v1613_v44, 0.0  ;;  %v1182_v21 = vmax.f32 %v3428_v5, %v2473_v32  ;;  %v2245_v37 = vpack.c.bf16 %v1651_v2, %v1650_v1  ;;  %v1573_v7 = vmax.f32 %v1179_v20, %v1526_v52 }
 0x15b   :  { %v1135_v8 = vpop.f32.mrf.mxu0  ;;  %v1618_v36 = vadd.f32 %v3129_v16, %v1575_v45  ;;  %v1529_v24 = vpop.f32.mrf.mxu1 }
 0x15c   :  { %v2240_v35 = vpack.c.bf16 %v1649_v47, %v1648_v33  ;;  %v1576_v9 = vmax.f32 %v1182_v21, %v2513_v34  ;;  %2271 = vst [vmem:[%s3326_s3 + $0x78] sm:$0xff] %v2245_v37   ;;  %v1180_v12 = vmax.f32 %v3431_v51, %v1135_v8  ;;  %v1616_v14 = vadd.f32 %v3129_v16, %v1573_v7 }
 0x15d   :  { %v1654_v11 = vmax.f32 %v1618_v36, 0.0 }
 0x15e   :  { %2270 = vst [vmem:[%s3326_s3 + $0x70] sm:$0xff] %v2240_v35   ;;  %v1619_v23 = vadd.f32 %v3129_v16, %v1576_v9  ;;  %v1574_v10 = vmax.f32 %v1180_v12, %v1529_v24  ;;  %v1652_v31 = vmax.f32 %v1616_v14, 0.0 }
 0x160   :  { %v1655_v53 = vmax.f32 %v1619_v23, 0.0  ;;  %v1617_v54 = vadd.f32 %v3129_v16, %v1574_v10 }
 0x162   :  { %v2255_v15 = vpack.c.bf16 %v1655_v53, %v1654_v11  ;;  %v1653_v17 = vmax.f32 %v1617_v54, 0.0 }
 0x164   :  { %2273 = vst [vmem:[%s3326_s3 + $0x88] sm:$0xff] %v2255_v15   ;;  %v2250_v40 = vpack.c.bf16 %v1653_v17, %v1652_v31 }
 0x166   :  { %2272 = vst [vmem:[%s3326_s3 + $0x80] sm:$0xff] %v2250_v40  }

// kernel: _lambda_.4
= control target key start
LH: loop header
LB: loop body
LE: loop exit
PB: predicated region body
PF: predicated region fallthrough
CT: control target
= control target key end

     0   :  { %vm320_vm0 = vcmask 1041408   ;;  %vm313_vm1 = vcmask 949248   ;;  %s1793_s1 = inlined_call_operand.vmem [shape: bf16[500,128], index: 1, kind: input, shape index: {}]   ;;  %s1794_s0 = inlined_call_operand.vmem [shape: bf16[4,32,500], index: 0, kind: input, shape index: {}]   ;;  %s1795_s2 = inlined_call_operand.vmem [shape: f32[1,128], index: 2, kind: input, shape index: {}]   ;;  %s1796_s3 = inlined_call_operand.vmem [shape: bf16[32,128], index: 3, kind: output, shape index: {}]  }
   0x1   :  { %v1373_v0 = vld [vmem:[%s1793_s1 + $0x78] sm:$0xff]   ;;  %v1397_v4 = vld [vmem:[%s1793_s1 + $0x70] sm:$0xff]   ;;  %v1421_v8 = vld [vmem:[%s1793_s1 + $0x68] sm:$0xff]  }
   0x2   :  { %v1378_v1 = vld [vmem:[%s1793_s1 + $0xf8] ss:$0 sps:$4 sm:$0x33]   ;;  %1042 = vmatprep.subr.bf16.mxu0 %v1373_v0  ;;  %v1403_v5 = vld [vmem:[%s1793_s1 + $0xf0] sm:$0xff]   ;;  %v1427_v9 = vld [vmem:[%s1793_s1 + $0xe8] sm:$0xff]  }
   0x3   :  { %v1383_v2 = vld [vmem:[%s1793_s1 + $0x38] sm:$0xff]   ;;  %1266 = vmatprep.subr.msk.bf16.mxu1 %vm320_vm0, %v1378_v1  ;;  %v1409_v6 = vld [vmem:[%s1793_s1 + $0x30] sm:$0xff]   ;;  %v1433_v10 = vld [vmem:[%s1793_s1 + $0x28] sm:$0xff]  }
   0x4   :  { %1043 = vmatpush3.bf16.msra.mxu0 %v1383_v2  ;;  %v1392_v3 = vld [vmem:[%s1793_s1 + $0xb8] sm:$0xff]   ;;  %v1415_v7 = vld [vmem:[%s1793_s1 + $0xb0] sm:$0xff]   ;;  %v1439_v11 = vld [vmem:[%s1793_s1 + $0xa8] sm:$0xff]  }
   0x5   :  { %1071 = vmatpush3.bf16.msra.mxu1 %v1392_v3  ;;  %1044 = vmatprep.subr.bf16.mxu0 %v1397_v4  ;;  %v1445_v12 = vld [vmem:[%s1793_s1 + $0x60] sm:$0xff]   ;;  %v1469_v16 = vld [vmem:[%s1793_s1 + $0x58] sm:$0xff]   ;;  %v1493_v20 = vld [vmem:[%s1793_s1 + $0x50] sm:$0xff]  }
   0x6   :  { %1072 = vmatprep.subr.bf16.mxu1 %v1403_v5  ;;  %v1451_v13 = vld [vmem:[%s1793_s1 + $0xe0] sm:$0xff]   ;;  %v1475_v17 = vld [vmem:[%s1793_s1 + $0xd8] sm:$0xff]   ;;  %v1499_v21 = vld [vmem:[%s1793_s1 + $0xd0] sm:$0xff]  }
   0x7   :  { %v1457_v14 = vld [vmem:[%s1793_s1 + $0x20] sm:$0xff]   ;;  %v1481_v18 = vld [vmem:[%s1793_s1 + $0x18] sm:$0xff]   ;;  %v1505_v22 = vld [vmem:[%s1793_s1 + $0x10] sm:$0xff]  }
   0x8   :  { %1045 = vmatpush3.bf16.msra.mxu0 %v1409_v6  ;;  %v1463_v15 = vld [vmem:[%s1793_s1 + $0xa0] sm:$0xff]   ;;  %v1487_v19 = vld [vmem:[%s1793_s1 + $0x98] sm:$0xff]   ;;  %v1511_v23 = vld [vmem:[%s1793_s1 + $0x90] sm:$0xff]  }
   0x9   :  { %1073 = vmatpush3.bf16.msra.mxu1 %v1415_v7  ;;  %1046 = vmatprep.subr.bf16.mxu0 %v1421_v8  ;;  %v1517_v24 = vld [vmem:[%s1793_s1 + $0x48] sm:$0xff]   ;;  %v1541_v28 = vld [vmem:[%s1793_s1 + $0x40] sm:$0xff]  }
   0xa   :  { %1074 = vmatprep.subr.bf16.mxu1 %v1427_v9  ;;  %v1523_v25 = vld [vmem:[%s1793_s1 + $0xc8] sm:$0xff]   ;;  %v1547_v29 = vld [vmem:[%s1793_s1 + $0xc0] sm:$0xff]  }
   0xb   :  { %v1529_v26 = vld [vmem:[%s1793_s1 + $0x8] sm:$0xff]   ;;  %v1553_v30 = vld [vmem:[%s1793_s1] sm:$0xff]  }
   0xc   :  { %1047 = vmatpush3.bf16.msra.mxu0 %v1433_v10  ;;  %v1535_v27 = vld [vmem:[%s1793_s1 + $0x88] sm:$0xff]   ;;  %v1559_v31 = vld [vmem:[%s1793_s1 + $0x80] sm:$0xff]  }
   0xd   :  { %1075 = vmatpush3.bf16.msra.mxu1 %v1439_v11  ;;  %1048 = vmatprep.subr.bf16.mxu0 %v1445_v12  ;;  %v1302_v32 = vld [vmem:[%s1794_s0] ss:$16 sps:$4 sm:$0xff]   ;;  %v1304_v33 = vld [vmem:[%s1794_s0 + $0x4] ss:$16 sps:$4 sm:$0xff]   ;;  %v1305_v34 = vld [vmem:[%s1794_s0 + $0x8] ss:$16 sps:$4 sm:$0xff]  }
   0xe   :  { %1076 = vmatprep.subr.bf16.mxu1 %v1451_v13  ;;  %356 = vmatprep.mubr.bf16.mxu0 %v1304_v33  ;;  %v1307_v35 = vld [vmem:[%s1794_s0 + $0xc] ss:$16 sps:$4 sm:$0xff]   ;;  %v1308_v36 = vld [vmem:[%s1794_s0 + $0x24] ss:$16 sps:$4 sm:$0xff]   ;;  %v1312_v38 = vld [vmem:[%s1794_s0 + $0x20] ss:$16 sps:$4 sm:$0xff]  }
   0xf   :  { %966 = vmatprep.mubr.msk.bf16.mxu1 %vm313_vm1, %v1307_v35  ;;  %v1310_v37 = vld [vmem:[%s1794_s0 + $0x2c] ss:$16 sps:$4 sm:$0xff]   ;;  %v1316_v39 = vld [vmem:[%s1794_s0 + $0x44] ss:$16 sps:$4 sm:$0xff]   ;;  %v1313_v40 = vld [vmem:[%s1794_s0 + $0x28] ss:$16 sps:$4 sm:$0xff]  }
  0x10   :  { %1049 = vmatpush3.bf16.msra.mxu0 %v1457_v14  ;;  %v1319_v41 = vld [vmem:[%s1794_s0 + $0x4c] ss:$16 sps:$4 sm:$0xff]   ;;  %v1314_v42 = vld [vmem:[%s1794_s0 + $0x40] ss:$16 sps:$4 sm:$0xff]   ;;  %v1320_v43 = vld [vmem:[%s1794_s0 + $0x64] ss:$16 sps:$4 sm:$0xff]  }
  0x11   :  { %1077 = vmatpush3.bf16.msra.mxu1 %v1463_v15  ;;  %1050 = vmatprep.subr.bf16.mxu0 %v1469_v16  ;;  %v1317_v44 = vld [vmem:[%s1794_s0 + $0x48] ss:$16 sps:$4 sm:$0xff]   ;;  %v1322_v45 = vld [vmem:[%s1794_s0 + $0x6c] ss:$16 sps:$4 sm:$0xff]   ;;  %v1324_v46 = vld [vmem:[%s1794_s0 + $0x60] ss:$16 sps:$4 sm:$0xff]  }
  0x12   :  { %1078 = vmatprep.subr.bf16.mxu1 %v1475_v17  ;;  %v1328_v47 = vld [vmem:[%s1794_s0 + $0x84] ss:$16 sps:$4 sm:$0xff]   ;;  %v1325_v48 = vld [vmem:[%s1794_s0 + $0x68] ss:$16 sps:$4 sm:$0xff]   ;;  %v1331_v49 = vld [vmem:[%s1794_s0 + $0x8c] ss:$16 sps:$4 sm:$0xff]  }
  0x13   :  { %v1326_v50 = vld [vmem:[%s1794_s0 + $0x80] ss:$16 sps:$4 sm:$0xff]   ;;  %v1332_v51 = vld [vmem:[%s1794_s0 + $0xa4] ss:$16 sps:$4 sm:$0xff]   ;;  %v1329_v52 = vld [vmem:[%s1794_s0 + $0x88] ss:$16 sps:$4 sm:$0xff]  }
  0x14   :  { %1051 = vmatpush3.bf16.msra.mxu0 %v1481_v18  ;;  %v1334_v53 = vld [vmem:[%s1794_s0 + $0xac] ss:$16 sps:$4 sm:$0xff]   ;;  %v1336_v54 = vld [vmem:[%s1794_s0 + $0xa0] ss:$16 sps:$4 sm:$0xff]   ;;  %v1340_v55 = vld [vmem:[%s1794_s0 + $0xc4] ss:$16 sps:$4 sm:$0xff]  }
  0x15   :  { %1079 = vmatpush3.bf16.msra.mxu1 %v1487_v19  ;;  %1052 = vmatprep.subr.bf16.mxu0 %v1493_v20  ;;  %v1337_v56 = vld [vmem:[%s1794_s0 + $0xa8] ss:$16 sps:$4 sm:$0xff]   ;;  %v1343_v57 = vld [vmem:[%s1794_s0 + $0xcc] ss:$16 sps:$4 sm:$0xff]   ;;  %v1338_v58 = vld [vmem:[%s1794_s0 + $0xc0] ss:$16 sps:$4 sm:$0xff]  }
  0x16   :  { %1080 = vmatprep.subr.bf16.mxu1 %v1499_v21  ;;  %v1344_v59 = vld [vmem:[%s1794_s0 + $0xe4] ss:$16 sps:$4 sm:$0xff]   ;;  %v1341_v60 = vld [vmem:[%s1794_s0 + $0xc8] ss:$16 sps:$4 sm:$0xff]   ;;  %v1346_v61 = vld [vmem:[%s1794_s0 + $0xec] ss:$16 sps:$4 sm:$0xff]  }
  0x17   :  { %v1348_v62 = vld [vmem:[%s1794_s0 + $0xe0] ss:$16 sps:$4 sm:$0xff]   ;;  %v1349_v63 = vld [vmem:[%s1794_s0 + $0xe8] ss:$16 sps:$4 sm:$0xff]  }
  0x18   :  { %1053 = vmatpush3.bf16.msra.mxu0 %v1505_v22 }
  0x19   :  { %1081 = vmatpush3.bf16.msra.mxu1 %v1511_v23  ;;  %1054 = vmatprep.subr.bf16.mxu0 %v1517_v24 }
  0x1a   :  { %1082 = vmatprep.subr.bf16.mxu1 %v1523_v25 }
  0x1c   :  { %1055 = vmatpush3.bf16.msra.mxu0 %v1529_v26 }
  0x1d   :  { %1083 = vmatpush3.bf16.msra.mxu1 %v1535_v27  ;;  %1056 = vmatprep.subr.bf16.mxu0 %v1541_v28 }
  0x1e   :  { %1084 = vmatprep.subr.bf16.mxu1 %v1547_v29 }
  0x20   :  { %1057 = vmatpush3.bf16.msra.mxu0 %v1553_v30 }
  0x21   :  { %1085 = vmatpush3.bf16.msra.mxu1 %v1559_v31  ;;  %1098 = vmatprep.subr.bf16.mxu0 %v1373_v0 }
  0x22   :  { %1267 = vmatprep.subr.msk.bf16.mxu1 %vm320_vm0, %v1378_v1 }
  0x23   :  { %357 = vmatmul.mubr.bf16.vlgmr.msra.gmra.mxu0 %v1302_v32 }
  0x24   :  { %1099 = vmatpush3.bf16.msra.mxu0 %v1383_v2  ;;  %406 = vmatmul.mubr.bf16.vlgmr.msra.gmra.mxu1 %v1305_v34 }
  0x25   :  { %1100 = vmatprep.subr.bf16.mxu0 %v1397_v4  ;;  %1127 = vmatpush3.bf16.msra.mxu1 %v1392_v3 }
  0x26   :  { %364 = vmatprep.mubr.bf16.mxu0 %v1308_v36  ;;  %1128 = vmatprep.subr.bf16.mxu1 %v1403_v5 }
  0x27   :  { %967 = vmatprep.mubr.msk.bf16.mxu1 %vm313_vm1, %v1310_v37 }
  0x28   :  { %1101 = vmatpush3.bf16.msra.mxu0 %v1409_v6 }
  0x29   :  { %1102 = vmatprep.subr.bf16.mxu0 %v1421_v8  ;;  %1129 = vmatpush3.bf16.msra.mxu1 %v1415_v7 }
  0x2a   :  { %1130 = vmatprep.subr.bf16.mxu1 %v1427_v9 }
  0x2b   :  { %365 = vmatmul.mubr.bf16.gmra.mxu0 %v1312_v38 }
  0x2c   :  { %1103 = vmatpush3.bf16.msra.mxu0 %v1433_v10  ;;  %507 = vmatprep.mubr.bf16.mxu0 %v1316_v39 }
  0x2d   :  { %1104 = vmatprep.subr.bf16.mxu0 %v1445_v12  ;;  %414 = vmatmul.mubr.bf16.gmra.mxu1 %v1313_v40 }
  0x2e   :  { %1131 = vmatpush3.bf16.msra.mxu1 %v1439_v11  ;;  %984 = vmatprep.mubr.msk.bf16.mxu1 %vm313_vm1, %v1319_v41 }
  0x2f   :  { %1132 = vmatprep.subr.bf16.mxu1 %v1451_v13 }
  0x30   :  { %1105 = vmatpush3.bf16.msra.mxu0 %v1457_v14 }
  0x31   :  { %1106 = vmatprep.subr.bf16.mxu0 %v1469_v16 }
  0x32   :  { %1133 = vmatpush3.bf16.msra.mxu1 %v1463_v15 }
  0x33   :  { %1134 = vmatprep.subr.bf16.mxu1 %v1475_v17 }
  0x34   :  { %1107 = vmatpush3.bf16.msra.mxu0 %v1481_v18 }
  0x35   :  { %1108 = vmatprep.subr.bf16.mxu0 %v1493_v20 }
  0x36   :  { %1135 = vmatpush3.bf16.msra.mxu1 %v1487_v19 }
  0x37   :  { %1136 = vmatprep.subr.bf16.mxu1 %v1499_v21 }
  0x38   :  { %1109 = vmatpush3.bf16.msra.mxu0 %v1505_v22 }
  0x39   :  { %1110 = vmatprep.subr.bf16.mxu0 %v1517_v24 }
  0x3a   :  { %1137 = vmatpush3.bf16.msra.mxu1 %v1511_v23 }
  0x3b   :  { %1138 = vmatprep.subr.bf16.mxu1 %v1523_v25 }
  0x3c   :  { %1111 = vmatpush3.bf16.msra.mxu0 %v1529_v26 }
  0x3d   :  { %1112 = vmatprep.subr.bf16.mxu0 %v1541_v28 }
  0x3e   :  { %1139 = vmatpush3.bf16.msra.mxu1 %v1535_v27 }
  0x3f   :  { %1140 = vmatprep.subr.bf16.mxu1 %v1547_v29 }
  0x40   :  { %1113 = vmatpush3.bf16.msra.mxu0 %v1553_v30 }
  0x41   :  { %1154 = vmatprep.subr.bf16.mxu0 %v1373_v0 }
  0x42   :  { %1141 = vmatpush3.bf16.msra.mxu1 %v1559_v31 }
  0x43   :  { %508 = vmatmul.mubr.bf16.vlgmr.msra.gmra.mxu0 %v1314_v42  ;;  %1268 = vmatprep.subr.msk.bf16.mxu1 %vm320_vm0, %v1378_v1 }
  0x44   :  { %1155 = vmatpush3.bf16.msra.mxu0 %v1383_v2  ;;  %515 = vmatprep.mubr.bf16.mxu0 %v1320_v43 }
  0x45   :  { %557 = vmatmul.mubr.bf16.vlgmr.msra.gmra.mxu1 %v1317_v44  ;;  %1156 = vmatprep.subr.bf16.mxu0 %v1397_v4 }
  0x46   :  { %1183 = vmatpush3.bf16.msra.mxu1 %v1392_v3  ;;  %985 = vmatprep.mubr.msk.bf16.mxu1 %vm313_vm1, %v1322_v45 }
  0x47   :  { %1184 = vmatprep.subr.bf16.mxu1 %v1403_v5 }
  0x48   :  { %1157 = vmatpush3.bf16.msra.mxu0 %v1409_v6 }
  0x49   :  { %1158 = vmatprep.subr.bf16.mxu0 %v1421_v8 }
  0x4a   :  { %1185 = vmatpush3.bf16.msra.mxu1 %v1415_v7 }
  0x4b   :  { %516 = vmatmul.mubr.bf16.gmra.mxu0 %v1324_v46  ;;  %1186 = vmatprep.subr.bf16.mxu1 %v1427_v9 }
  0x4c   :  { %1159 = vmatpush3.bf16.msra.mxu0 %v1433_v10  ;;  %662 = vmatprep.mubr.bf16.mxu0 %v1328_v47 }
  0x4d   :  { %565 = vmatmul.mubr.bf16.gmra.mxu1 %v1325_v48  ;;  %1160 = vmatprep.subr.bf16.mxu0 %v1445_v12 }
  0x4e   :  { %1187 = vmatpush3.bf16.msra.mxu1 %v1439_v11  ;;  %1002 = vmatprep.mubr.msk.bf16.mxu1 %vm313_vm1, %v1331_v49 }
  0x4f   :  { %1188 = vmatprep.subr.bf16.mxu1 %v1451_v13 }
  0x50   :  { %1161 = vmatpush3.bf16.msra.mxu0 %v1457_v14 }
  0x51   :  { %1162 = vmatprep.subr.bf16.mxu0 %v1469_v16 }
  0x52   :  { %1189 = vmatpush3.bf16.msra.mxu1 %v1463_v15 }
  0x53   :  { %1190 = vmatprep.subr.bf16.mxu1 %v1475_v17 }
  0x54   :  { %1163 = vmatpush3.bf16.msra.mxu0 %v1481_v18 }
  0x55   :  { %1164 = vmatprep.subr.bf16.mxu0 %v1493_v20 }
  0x56   :  { %1191 = vmatpush3.bf16.msra.mxu1 %v1487_v19 }
  0x57   :  { %1192 = vmatprep.subr.bf16.mxu1 %v1499_v21 }
  0x58   :  { %1165 = vmatpush3.bf16.msra.mxu0 %v1505_v22 }
  0x59   :  { %1166 = vmatprep.subr.bf16.mxu0 %v1517_v24 }
  0x5a   :  { %1193 = vmatpush3.bf16.msra.mxu1 %v1511_v23 }
  0x5b   :  { %1194 = vmatprep.subr.bf16.mxu1 %v1523_v25 }
  0x5c   :  { %1167 = vmatpush3.bf16.msra.mxu0 %v1529_v26 }
  0x5d   :  { %1168 = vmatprep.subr.bf16.mxu0 %v1541_v28 }
  0x5e   :  { %1195 = vmatpush3.bf16.msra.mxu1 %v1535_v27 }
  0x5f   :  { %1196 = vmatprep.subr.bf16.mxu1 %v1547_v29 }
  0x60   :  { %1169 = vmatpush3.bf16.msra.mxu0 %v1553_v30 }
  0x61   :  { %1210 = vmatprep.subr.bf16.mxu0 %v1373_v0 }
  0x62   :  { %1197 = vmatpush3.bf16.msra.mxu1 %v1559_v31 }
  0x63   :  { %663 = vmatmul.mubr.bf16.vlgmr.msra.gmra.mxu0 %v1326_v50  ;;  %1269 = vmatprep.subr.msk.bf16.mxu1 %vm320_vm0, %v1378_v1 }
  0x64   :  { %1211 = vmatpush3.bf16.msra.mxu0 %v1383_v2  ;;  %670 = vmatprep.mubr.bf16.mxu0 %v1332_v51 }
  0x65   :  { %712 = vmatmul.mubr.bf16.vlgmr.msra.gmra.mxu1 %v1329_v52  ;;  %1212 = vmatprep.subr.bf16.mxu0 %v1397_v4 }
  0x66   :  { %1239 = vmatpush3.bf16.msra.mxu1 %v1392_v3  ;;  %1003 = vmatprep.mubr.msk.bf16.mxu1 %vm313_vm1, %v1334_v53 }
  0x67   :  { %1240 = vmatprep.subr.bf16.mxu1 %v1403_v5 }
  0x68   :  { %1213 = vmatpush3.bf16.msra.mxu0 %v1409_v6 }
  0x69   :  { %1214 = vmatprep.subr.bf16.mxu0 %v1421_v8 }
  0x6a   :  { %1241 = vmatpush3.bf16.msra.mxu1 %v1415_v7 }
  0x6b   :  { %671 = vmatmul.mubr.bf16.gmra.mxu0 %v1336_v54  ;;  %1242 = vmatprep.subr.bf16.mxu1 %v1427_v9 }
  0x6c   :  { %1215 = vmatpush3.bf16.msra.mxu0 %v1433_v10  ;;  %817 = vmatprep.mubr.bf16.mxu0 %v1340_v55 }
  0x6d   :  { %720 = vmatmul.mubr.bf16.gmra.mxu1 %v1337_v56  ;;  %1216 = vmatprep.subr.bf16.mxu0 %v1445_v12 }
  0x6e   :  { %1243 = vmatpush3.bf16.msra.mxu1 %v1439_v11  ;;  %1020 = vmatprep.mubr.msk.bf16.mxu1 %vm313_vm1, %v1343_v57 }
  0x6f   :  { %1244 = vmatprep.subr.bf16.mxu1 %v1451_v13 }
  0x70   :  { %1217 = vmatpush3.bf16.msra.mxu0 %v1457_v14 }
  0x71   :  { %1218 = vmatprep.subr.bf16.mxu0 %v1469_v16 }
  0x72   :  { %1245 = vmatpush3.bf16.msra.mxu1 %v1463_v15 }
  0x73   :  { %1246 = vmatprep.subr.bf16.mxu1 %v1475_v17 }
  0x74   :  { %1219 = vmatpush3.bf16.msra.mxu0 %v1481_v18 }
  0x75   :  { %1220 = vmatprep.subr.bf16.mxu0 %v1493_v20 }
  0x76   :  { %1247 = vmatpush3.bf16.msra.mxu1 %v1487_v19 }
  0x77   :  { %1248 = vmatprep.subr.bf16.mxu1 %v1499_v21 }
  0x78   :  { %1221 = vmatpush3.bf16.msra.mxu0 %v1505_v22 }
  0x79   :  { %1222 = vmatprep.subr.bf16.mxu0 %v1517_v24 }
  0x7a   :  { %1249 = vmatpush3.bf16.msra.mxu1 %v1511_v23 }
  0x7b   :  { %1250 = vmatprep.subr.bf16.mxu1 %v1523_v25 }
  0x7c   :  { %1223 = vmatpush3.bf16.msra.mxu0 %v1529_v26 }
  0x7d   :  { %1224 = vmatprep.subr.bf16.mxu0 %v1541_v28 }
  0x7e   :  { %1251 = vmatpush3.bf16.msra.mxu1 %v1535_v27 }
  0x7f   :  { %1252 = vmatprep.subr.bf16.mxu1 %v1547_v29 }
  0x80   :  { %1225 = vmatpush3.bf16.msra.mxu0 %v1553_v30 }
  0x82   :  { %1253 = vmatpush3.bf16.msra.mxu1 %v1559_v31 }
  0x83   :  { %818 = vmatmul.mubr.bf16.vlgmr.msra.gmra.mxu0 %v1338_v58 }
  0x84   :  { %825 = vmatprep.mubr.bf16.mxu0 %v1344_v59 }
  0x85   :  { %867 = vmatmul.mubr.bf16.vlgmr.msra.gmra.mxu1 %v1341_v60 }
  0x86   :  { %1021 = vmatprep.mubr.msk.bf16.mxu1 %vm313_vm1, %v1346_v61 }
  0x8b   :  { %826 = vmatmul.mubr.bf16.gmra.mxu0 %v1348_v62 }
  0x8d   :  { %875 = vmatmul.mubr.bf16.gmra.mxu1 %v1349_v63 }
  0xe3   :  { %v1058_v0 = vpop.f32.mrf.mxu0 }
  0xe4   :  { %v1086_v1 = vpop.f32.mrf.mxu1 }
  0xe5   :  { %v1059_v2 = vpop.f32.mrf.mxu0 }
  0xe6   :  { %v1087_v3 = vpop.f32.mrf.mxu1  ;;  %v1060_v49 = vadd.f32 %v1059_v2, %v1058_v0 }
  0xe7   :  { %v1061_v4 = vpop.f32.mrf.mxu0  ;;  %v1088_v50 = vadd.f32 %v1087_v3, %v1086_v1 }
  0xe8   :  { %v1089_v5 = vpop.f32.mrf.mxu1 }
  0xe9   :  { %v1062_v6 = vpop.f32.mrf.mxu0 }
  0xea   :  { %v1090_v7 = vpop.f32.mrf.mxu1  ;;  %v1063_v58 = vadd.f32 %v1062_v6, %v1061_v4 }
  0xeb   :  { %v1766_v8 = vpop.f32.mrf.mxu0  ;;  %v1091_v59 = vadd.f32 %v1090_v7, %v1089_v5 }
  0xed   :  { %v1768_v9 = vpop.f32.mrf.mxu1  ;;  %v1065_v10 = vpop.f32.mrf.mxu0  ;;  %v411_v4 = vadd.f32 %v1091_v59, %v1063_v58 }
  0xee   :  { %v1066_v3 = vadd.f32 %v1065_v10, %v1766_v8 }
  0xef   :  { %v1093_v11 = vpop.f32.mrf.mxu1  ;;  %v1770_v12 = vpop.f32.mrf.mxu0 }
  0xf1   :  { %v1772_v13 = vpop.f32.mrf.mxu1  ;;  %v1774_v14 = vpop.f32.mrf.mxu0 }
  0xf2   :  { %1797 = vst [vmem:[#allocation2_spill] sm:$0xff] %v1772_v13 }
  0xf3   :  { %v1776_v15 = vpop.f32.mrf.mxu1 }
  0xf4   :  { %1798 = vst [vmem:[#allocation3_spill] sm:$0xff] %v1776_v15  ;;  %v408_v15 = vadd.f32 %v1088_v50, %v1060_v49 }
 0x103   :  { %v1114_v16 = vpop.f32.mrf.mxu0 }
 0x105   :  { %v1142_v17 = vpop.f32.mrf.mxu1  ;;  %v1115_v18 = vpop.f32.mrf.mxu0 }
 0x106   :  { %v1116_v46 = vadd.f32 %v1115_v18, %v1114_v16 }
 0x107   :  { %v1143_v19 = vpop.f32.mrf.mxu1  ;;  %v1117_v20 = vpop.f32.mrf.mxu0 }
 0x108   :  { %v1144_v47 = vadd.f32 %v1143_v19, %v1142_v17  ;;  %v1094_v19 = vadd.f32 %v1093_v11, %v1768_v9  ;;  %v1069_v11 = vadd.f32 %v1774_v14, %v1770_v12 }
 0x109   :  { %v1145_v21 = vpop.f32.mrf.mxu1  ;;  %v1118_v22 = vpop.f32.mrf.mxu0 }
 0x10a   :  { %v1119_v53 = vadd.f32 %v1118_v22, %v1117_v20  ;;  %v559_v57 = vadd.f32 %v1144_v47, %v1116_v46  ;;  %v416_v8 = vadd.f32 %v1094_v19, %v1066_v3 }
 0x10b   :  { %v1146_v23 = vpop.f32.mrf.mxu1  ;;  %v1120_v24 = vpop.f32.mrf.mxu0 }
 0x10c   :  { %v1147_v54 = vadd.f32 %v1146_v23, %v1145_v21  ;;  %v573_v20 = vmax.f32 %v408_v15, %v559_v57  ;;  %v1799_v15 = vld [vmem:[#allocation2_spill] sm:$0xff] }
 0x10d   :  { %v1148_v25 = vpop.f32.mrf.mxu1  ;;  %v1121_v26 = vpop.f32.mrf.mxu0 }
 0x10e   :  { %v562_v17 = vadd.f32 %v1147_v54, %v1119_v53  ;;  %v1122_v18 = vadd.f32 %v1121_v26, %v1120_v24 }
 0x10f   :  { %v1149_v27 = vpop.f32.mrf.mxu1  ;;  %v1123_v28 = vpop.f32.mrf.mxu0 }
 0x110   :  { %v1150_v0 = vadd.f32 %v1149_v27, %v1148_v25 }
 0x111   :  { %v1151_v29 = vpop.f32.mrf.mxu1  ;;  %v1124_v30 = vpop.f32.mrf.mxu0 }
 0x112   :  { %v567_v24 = vadd.f32 %v1150_v0, %v1122_v18  ;;  %v1125_v25 = vadd.f32 %v1124_v30, %v1123_v28 }
 0x113   :  { %v1152_v31 = vpop.f32.mrf.mxu1 }
 0x114   :  { %v1153_v26 = vadd.f32 %v1152_v31, %v1151_v29 }
 0x116   :  { %v570_v46 = vadd.f32 %v1153_v26, %v1125_v25 }
 0x123   :  { %v1170_v32 = vpop.f32.mrf.mxu0 }
 0x125   :  { %v1198_v33 = vpop.f32.mrf.mxu1  ;;  %v1171_v34 = vpop.f32.mrf.mxu0 }
 0x126   :  { %v1172_v51 = vadd.f32 %v1171_v34, %v1170_v32 }
 0x127   :  { %v1199_v35 = vpop.f32.mrf.mxu1  ;;  %v1173_v36 = vpop.f32.mrf.mxu0 }
 0x128   :  { %v1200_v52 = vadd.f32 %v1199_v35, %v1198_v33  ;;  %v574_v35 = vmax.f32 %v411_v4, %v562_v17 }
 0x129   :  { %v1201_v37 = vpop.f32.mrf.mxu1  ;;  %v1174_v38 = vpop.f32.mrf.mxu0 }
 0x12a   :  { %v1175_v60 = vadd.f32 %v1174_v38, %v1173_v36  ;;  %v714_v13 = vadd.f32 %v1200_v52, %v1172_v51 }
 0x12b   :  { %v1202_v39 = vpop.f32.mrf.mxu1  ;;  %v1176_v40 = vpop.f32.mrf.mxu0 }
 0x12c   :  { %v1203_v61 = vadd.f32 %v1202_v39, %v1201_v37  ;;  %v728_v32 = vmax.f32 %v573_v20, %v714_v13  ;;  %v1800_v37 = vld [vmem:[#allocation3_spill] sm:$0xff]  ;;  %v1022_v13 = vld [vmem:[%s1795_s2] ss:$0 sm:$0xff] }
 0x12d   :  { %v1204_v41 = vpop.f32.mrf.mxu1  ;;  %v1177_v42 = vpop.f32.mrf.mxu0  ;;  %v1097_v38 = vadd.f32 %v1800_v37, %v1799_v15 }
 0x12e   :  { %v717_v5 = vadd.f32 %v1203_v61, %v1175_v60  ;;  %v1178_v6 = vadd.f32 %v1177_v42, %v1176_v40 }
 0x12f   :  { %v1205_v43 = vpop.f32.mrf.mxu1  ;;  %v1179_v44 = vpop.f32.mrf.mxu0  ;;  %v419_v51 = vadd.f32 %v1097_v38, %v1069_v11 }
 0x130   :  { %v1206_v7 = vadd.f32 %v1205_v43, %v1204_v41  ;;  %v729_v39 = vmax.f32 %v574_v35, %v717_v5  ;;  %v575_v43 = vmax.f32 %v416_v8, %v567_v24 }
 0x131   :  { %v1207_v45 = vpop.f32.mrf.mxu1  ;;  %v1180_v48 = vpop.f32.mrf.mxu0  ;;  %v576_v60 = vmax.f32 %v419_v51, %v570_v46 }
 0x132   :  { %v722_v40 = vadd.f32 %v1206_v7, %v1178_v6  ;;  %v1181_v29 = vadd.f32 %v1180_v48, %v1179_v44 }
 0x133   :  { %v1208_v55 = vpop.f32.mrf.mxu1 }
 0x134   :  { %v1209_v30 = vadd.f32 %v1208_v55, %v1207_v45  ;;  %v730_v52 = vmax.f32 %v575_v43, %v722_v40 }
 0x143   :  { %v1226_v56 = vpop.f32.mrf.mxu0 }
 0x145   :  { %v1254_v62 = vpop.f32.mrf.mxu1  ;;  %v1227_v63 = vpop.f32.mrf.mxu0 }
 0x146   :  { %v1228_v16 = vadd.f32 %v1227_v63, %v1226_v56  ;;  %v725_v56 = vadd.f32 %v1209_v30, %v1181_v29 }
 0x147   :  { %v1255_v1 = vpop.f32.mrf.mxu1  ;;  %v1229_v2 = vpop.f32.mrf.mxu0 }
 0x148   :  { %v1256_v21 = vadd.f32 %v1255_v1, %v1254_v62  ;;  %v731_v62 = vmax.f32 %v576_v60, %v725_v56 }
 0x149   :  { %v1257_v22 = vpop.f32.mrf.mxu1  ;;  %v1230_v23 = vpop.f32.mrf.mxu0 }
 0x14a   :  { %v869_v33 = vadd.f32 %v1256_v21, %v1228_v16  ;;  %v1231_v34 = vadd.f32 %v1230_v23, %v1229_v2 }
 0x14b   :  { %v1258_v27 = vpop.f32.mrf.mxu1  ;;  %v1232_v36 = vpop.f32.mrf.mxu0 }
 0x14c   :  { %v883_v10 = vmax.f32 %v728_v32, %v869_v33  ;;  %v1259_v9 = vadd.f32 %v1258_v27, %v1257_v22 }
 0x14d   :  { %v1260_v41 = vpop.f32.mrf.mxu1  ;;  %v1233_v28 = vpop.f32.mrf.mxu0 }
 0x14e   :  { %v872_v31 = vadd.f32 %v1259_v9, %v1231_v34  ;;  %v1234_v42 = vadd.f32 %v1233_v28, %v1232_v36  ;;  %v894_v12 = vadd.f32 %v1022_v13, %v883_v10 }
 0x14f   :  { %v1261_v47 = vpop.f32.mrf.mxu1  ;;  %v1235_v49 = vpop.f32.mrf.mxu0 }
 0x150   :  { %v884_v14 = vmax.f32 %v729_v39, %v872_v31  ;;  %v1262_v50 = vadd.f32 %v1261_v47, %v1260_v41  ;;  %v898_v45 = vmax.f32 %v894_v12, 0.0 }
 0x151   :  { %v1263_v53 = vpop.f32.mrf.mxu1  ;;  %v1236_v54 = vpop.f32.mrf.mxu0 }
 0x152   :  { %v895_v57 = vadd.f32 %v1022_v13, %v884_v14  ;;  %v877_v58 = vadd.f32 %v1262_v50, %v1234_v42  ;;  %v1237_v59 = vadd.f32 %v1236_v54, %v1235_v49 }
 0x153   :  { %v1264_v44 = vpop.f32.mrf.mxu1 }
 0x154   :  { %v899_v48 = vmax.f32 %v895_v57, 0.0  ;;  %v885_v55 = vmax.f32 %v730_v52, %v877_v58  ;;  %v1265_v61 = vadd.f32 %v1264_v44, %v1263_v53 }
 0x156   :  { %v1034_v63 = vpack.c.bf16 %v899_v48, %v898_v45  ;;  %v880_v16 = vadd.f32 %v1265_v61, %v1237_v59  ;;  %v896_v17 = vadd.f32 %v1022_v13, %v885_v55 }
 0x158   :  { %1035 = vst [vmem:[%s1796_s3] sm:$0xff] %v1034_v63   ;;  %v886_v18 = vmax.f32 %v731_v62, %v880_v16  ;;  %v900_v1 = vmax.f32 %v896_v17, 0.0 }
 0x15a   :  { %v897_v0 = vadd.f32 %v1022_v13, %v886_v18 }
 0x15c   :  { %v901_v2 = vmax.f32 %v897_v0, 0.0 }
 0x15e   :  { %v1039_v3 = vpack.c.bf16 %v901_v2, %v900_v1 }
 0x160   :  { %1041 = vst [vmem:[%s1796_s3 + $0x8] sm:$0xff] %v1039_v3  }

// kernel: _lambda_.5
= control target key start
LH: loop header
LB: loop body
LE: loop exit
PB: predicated region body
PF: predicated region fallthrough
CT: control target
= control target key end

     0   :  { %vm1282_vm0 = vcmask 261120   ;;  %vm2805_vm1 = vmmov 0   ;;  %s3671_s1 = inlined_call_operand.vmem [shape: bf16[800,512], index: 1, kind: input, shape index: {}]   ;;  %s3672_s0 = inlined_call_operand.vmem [shape: bf16[8,800], index: 0, kind: input, shape index: {}]   ;;  %s3673_s3 = inlined_call_operand.vmem [shape: bf16[512,128], index: 3, kind: input, shape index: {}]   ;;  %s3674_s2 = inlined_call_operand.vmem [shape: f32[1,512], index: 2, kind: input, shape index: {}]   ;;  %s3675_s7 = inlined_call_operand.vmem [shape: f32[8,512], index: 7, kind: output, shape index: {0}]   ;;  %s3676_s5 = inlined_call_operand.vmem [shape: bf16[128,128], index: 5, kind: input, shape index: {}]   ;;  %s3677_s4 = inlined_call_operand.vmem [shape: f32[1,128], index: 4, kind: input, shape index: {}, may-alias: {4,6}]   ;;  %s3678_s8 = inlined_call_operand.vmem [shape: f32[8,128], index: 8, kind: output, shape index: {1}]   ;;  %s3679_s6 = inlined_call_operand.vmem [shape: f32[1,128], index: 6, kind: input, shape index: {}, may-alias: {4,6}]   ;;  %s3680_s9 = inlined_call_operand.vmem [shape: f32[8,128], index: 9, kind: output, shape index: {2}]   ;;  %s3681_s10 = inlined_call_operand.vmem [shape: f32[8,128], index: 10, kind: output, shape index: {3}]   ;;  %s3682_s11 = inlined_call_operand.vmem [shape: f32[8,128], index: 11, kind: output, shape index: {4}]  }
   0x1   :  { %v2450_v0 = vld [vmem:[%s3671_s1 + $0xe4] ss:$16 sps:$4 sm:$0xff]   ;;  %v2454_v2 = vld [vmem:[%s3671_s1 + $0xe0] ss:$16 sps:$4 sm:$0xff]   ;;  %v33_v50 = vld [vmem:[%s3672_s0 + $0x8] sm:$0xff] }
   0x2   :  { %v2452_v1 = vld [vmem:[%s3671_s1 + $0x2e4] ss:$16 sps:$4 sm:$0xff]   ;;  %1286 = vmatprep.subr.bf16.mxu0 %v2450_v0  ;;  %v2455_v3 = vld [vmem:[%s3671_s1 + $0x2e0] ss:$16 sps:$4 sm:$0xff]   ;;  %v3021_v52 = vcombine.high %v33_v50, %v33_v50 }
   0x3   :  { %1327 = vmatprep.subr.bf16.mxu1 %v2452_v1  ;;  %v2456_v4 = vld [vmem:[%s3671_s1 + $0xc4] ss:$16 sps:$4 sm:$0xff]   ;;  %1287 = vmatpush1.bf16.msra.mxu0 %v2454_v2  ;;  %v2460_v6 = vld [vmem:[%s3671_s1 + $0xc0] ss:$16 sps:$4 sm:$0xff]  }
   0x4   :  { %1328 = vmatpush1.bf16.msra.mxu1 %v2455_v3  ;;  %v2458_v5 = vld [vmem:[%s3671_s1 + $0x2c4] ss:$16 sps:$4 sm:$0xff]   ;;  %1288 = vmatprep.subr.bf16.mxu0 %v2456_v4  ;;  %v2461_v7 = vld [vmem:[%s3671_s1 + $0x2c0] ss:$16 sps:$4 sm:$0xff]  }
   0x5   :  { %1329 = vmatprep.subr.bf16.mxu1 %v2458_v5  ;;  %v2462_v8 = vld [vmem:[%s3671_s1 + $0xa4] ss:$16 sps:$4 sm:$0xff]   ;;  %v2466_v10 = vld [vmem:[%s3671_s1 + $0xa0] ss:$16 sps:$4 sm:$0xff]   ;;  %1359 = vmatprep.mubr.bf16.mxu1 %v3021_v52 }
   0x6   :  { %v2464_v9 = vld [vmem:[%s3671_s1 + $0x2a4] ss:$16 sps:$4 sm:$0xff]   ;;  %v2467_v11 = vld [vmem:[%s3671_s1 + $0x2a0] ss:$16 sps:$4 sm:$0xff]  }
   0x7   :  { %1289 = vmatpush1.bf16.msra.mxu0 %v2460_v6  ;;  %v2468_v12 = vld [vmem:[%s3671_s1 + $0x84] ss:$16 sps:$4 sm:$0xff]   ;;  %v2472_v14 = vld [vmem:[%s3671_s1 + $0x80] ss:$16 sps:$4 sm:$0xff]  }
   0x8   :  { %1330 = vmatpush1.bf16.msra.mxu1 %v2461_v7  ;;  %1290 = vmatprep.subr.bf16.mxu0 %v2462_v8  ;;  %v2470_v13 = vld [vmem:[%s3671_s1 + $0x284] ss:$16 sps:$4 sm:$0xff]   ;;  %v2473_v15 = vld [vmem:[%s3671_s1 + $0x280] ss:$16 sps:$4 sm:$0xff]   ;;  %v3078_v7 = vcombine.low %v33_v50, %v33_v50 }
   0x9   :  { %1331 = vmatprep.subr.bf16.mxu1 %v2464_v9  ;;  %v2474_v16 = vld [vmem:[%s3671_s1 + $0x64] ss:$16 sps:$4 sm:$0xff]   ;;  %v2478_v18 = vld [vmem:[%s3671_s1 + $0x60] ss:$16 sps:$4 sm:$0xff]  }
   0xa   :  { %v2476_v17 = vld [vmem:[%s3671_s1 + $0x264] ss:$16 sps:$4 sm:$0xff]   ;;  %v2479_v19 = vld [vmem:[%s3671_s1 + $0x260] ss:$16 sps:$4 sm:$0xff]  }
   0xb   :  { %1291 = vmatpush1.bf16.msra.mxu0 %v2466_v10  ;;  %v2480_v20 = vld [vmem:[%s3671_s1 + $0x44] ss:$16 sps:$4 sm:$0xff]   ;;  %v2484_v22 = vld [vmem:[%s3671_s1 + $0x40] ss:$16 sps:$4 sm:$0xff]  }
   0xc   :  { %1332 = vmatpush1.bf16.msra.mxu1 %v2467_v11  ;;  %1292 = vmatprep.subr.bf16.mxu0 %v2468_v12  ;;  %v2482_v21 = vld [vmem:[%s3671_s1 + $0x244] ss:$16 sps:$4 sm:$0xff]   ;;  %v2485_v23 = vld [vmem:[%s3671_s1 + $0x240] ss:$16 sps:$4 sm:$0xff]  }
   0xd   :  { %1333 = vmatprep.subr.bf16.mxu1 %v2470_v13  ;;  %v2486_v24 = vld [vmem:[%s3671_s1 + $0x24] ss:$16 sps:$4 sm:$0xff]   ;;  %v2490_v26 = vld [vmem:[%s3671_s1 + $0x20] ss:$16 sps:$4 sm:$0xff]  }
   0xe   :  { %v2488_v25 = vld [vmem:[%s3671_s1 + $0x224] ss:$16 sps:$4 sm:$0xff]   ;;  %v2491_v27 = vld [vmem:[%s3671_s1 + $0x220] ss:$16 sps:$4 sm:$0xff]  }
   0xf   :  { %1293 = vmatpush1.bf16.msra.mxu0 %v2472_v14  ;;  %v2492_v28 = vld [vmem:[%s3671_s1 + $0x4] ss:$16 sps:$4 sm:$0xff]   ;;  %v2496_v30 = vld [vmem:[%s3671_s1] ss:$16 sps:$4 sm:$0xff]  }
  0x10   :  { %1334 = vmatpush1.bf16.msra.mxu1 %v2473_v15  ;;  %1294 = vmatprep.subr.bf16.mxu0 %v2474_v16  ;;  %v2494_v29 = vld [vmem:[%s3671_s1 + $0x204] ss:$16 sps:$4 sm:$0xff]   ;;  %v2497_v31 = vld [vmem:[%s3671_s1 + $0x200] ss:$16 sps:$4 sm:$0xff]   ;;  %v2568_v15 = vld [vmem:[%s3671_s1 + $0xec] ss:$16 sps:$4 sm:$0xff]  }
  0x11   :  { %1335 = vmatprep.subr.bf16.mxu1 %v2476_v17  ;;  %v2498_v32 = vld [vmem:[%s3671_s1 + $0x1e4] ss:$16 sps:$4 sm:$0xff]   ;;  %v2502_v34 = vld [vmem:[%s3671_s1 + $0x1e0] ss:$16 sps:$4 sm:$0xff]   ;;  %v3109_v16 = vld [vmem:[%s3672_s0 + $0x18] ss:$0 sps:$4 sm:$0xff]  }
  0x12   :  { %v2500_v33 = vld [vmem:[%s3671_s1 + $0x3e4] ss:$16 sps:$4 sm:$0xff]   ;;  %v2503_v35 = vld [vmem:[%s3671_s1 + $0x3e0] ss:$16 sps:$4 sm:$0xff]   ;;  %v2803_v17 = vmov 0  }
  0x13   :  { %1295 = vmatpush1.bf16.msra.mxu0 %v2478_v18  ;;  %v2504_v36 = vld [vmem:[%s3671_s1 + $0x1c4] ss:$16 sps:$4 sm:$0xff]   ;;  %v2508_v38 = vld [vmem:[%s3671_s1 + $0x1c0] ss:$16 sps:$4 sm:$0xff]  }
  0x14   :  { %1336 = vmatpush1.bf16.msra.mxu1 %v2479_v19  ;;  %1296 = vmatprep.subr.bf16.mxu0 %v2480_v20  ;;  %v2506_v37 = vld [vmem:[%s3671_s1 + $0x3c4] ss:$16 sps:$4 sm:$0xff]   ;;  %v2509_v39 = vld [vmem:[%s3671_s1 + $0x3c0] ss:$16 sps:$4 sm:$0xff]   ;;  %v2566_v19 = vld [vmem:[%s3671_s1 + $0xe8] ss:$16 sps:$4 sm:$0xff]  }
  0x15   :  { %1337 = vmatprep.subr.bf16.mxu1 %v2482_v21  ;;  %v2510_v40 = vld [vmem:[%s3671_s1 + $0x1a4] ss:$16 sps:$4 sm:$0xff]   ;;  %v2514_v42 = vld [vmem:[%s3671_s1 + $0x1a0] ss:$16 sps:$4 sm:$0xff]   ;;  %v2574_v21 = vld [vmem:[%s3671_s1 + $0xcc] ss:$16 sps:$4 sm:$0xff]  }
  0x16   :  { %v2512_v41 = vld [vmem:[%s3671_s1 + $0x3a4] ss:$16 sps:$4 sm:$0xff]   ;;  %v2515_v43 = vld [vmem:[%s3671_s1 + $0x3a0] ss:$16 sps:$4 sm:$0xff]  }
  0x17   :  { %1297 = vmatpush1.bf16.msra.mxu0 %v2484_v22  ;;  %v2516_v44 = vld [vmem:[%s3671_s1 + $0x184] ss:$16 sps:$4 sm:$0xff]   ;;  %v2520_v46 = vld [vmem:[%s3671_s1 + $0x180] ss:$16 sps:$4 sm:$0xff]  }
  0x18   :  { %1338 = vmatpush1.bf16.msra.mxu1 %v2485_v23  ;;  %1298 = vmatprep.subr.bf16.mxu0 %v2486_v24  ;;  %v2518_v45 = vld [vmem:[%s3671_s1 + $0x384] ss:$16 sps:$4 sm:$0xff]   ;;  %v2521_v48 = vld [vmem:[%s3671_s1 + $0x380] ss:$16 sps:$4 sm:$0xff]   ;;  %v2572_v23 = vld [vmem:[%s3671_s1 + $0xc8] ss:$16 sps:$4 sm:$0xff]  }
  0x19   :  { %1339 = vmatprep.subr.bf16.mxu1 %v2488_v25  ;;  %v32_v47 = vld [vmem:[%s3672_s0] sm:$0xff]  ;;  %v2580_v25 = vld [vmem:[%s3671_s1 + $0xac] ss:$16 sps:$4 sm:$0xff]  }
  0x1a   :  { %v3013_v49 = vcombine.high %v32_v47, %v32_v47  ;;  %v2522_v51 = vld [vmem:[%s3671_s1 + $0x164] ss:$16 sps:$4 sm:$0xff]   ;;  %v2526_v54 = vld [vmem:[%s3671_s1 + $0x160] ss:$16 sps:$4 sm:$0xff]   ;;  %v3076_v6 = vcombine.low %v32_v47, %v32_v47  ;;  %v2610_v47 = vld [vmem:[%s3671_s1 + $0xc] ss:$16 sps:$4 sm:$0xff]  }
  0x1b   :  { %1299 = vmatpush1.bf16.msra.mxu0 %v2490_v26  ;;  %v2524_v53 = vld [vmem:[%s3671_s1 + $0x364] ss:$16 sps:$4 sm:$0xff]   ;;  %v2527_v55 = vld [vmem:[%s3671_s1 + $0x360] ss:$16 sps:$4 sm:$0xff]  }
  0x1c   :  { %1340 = vmatpush1.bf16.msra.mxu1 %v2491_v27  ;;  %1300 = vmatprep.subr.bf16.mxu0 %v2492_v28  ;;  %v2528_v56 = vld [vmem:[%s3671_s1 + $0x144] ss:$16 sps:$4 sm:$0xff]   ;;  %v2532_v58 = vld [vmem:[%s3671_s1 + $0x140] ss:$16 sps:$4 sm:$0xff]   ;;  %v2578_v27 = vld [vmem:[%s3671_s1 + $0xa8] ss:$16 sps:$4 sm:$0xff]  }
  0x1d   :  { %1341 = vmatprep.subr.bf16.mxu1 %v2494_v29  ;;  %1318 = vmatprep.mubr.bf16.mxu0 %v3013_v49  ;;  %v2530_v57 = vld [vmem:[%s3671_s1 + $0x344] ss:$16 sps:$4 sm:$0xff]   ;;  %v2533_v59 = vld [vmem:[%s3671_s1 + $0x340] ss:$16 sps:$4 sm:$0xff]   ;;  %v2586_v29 = vld [vmem:[%s3671_s1 + $0x8c] ss:$16 sps:$4 sm:$0xff]  }
  0x1e   :  { %v2534_v60 = vld [vmem:[%s3671_s1 + $0x124] ss:$16 sps:$4 sm:$0xff]   ;;  %v2538_v62 = vld [vmem:[%s3671_s1 + $0x120] ss:$16 sps:$4 sm:$0xff]  }
  0x1f   :  { %1301 = vmatpush1.bf16.msra.mxu0 %v2496_v30  ;;  %v2536_v61 = vld [vmem:[%s3671_s1 + $0x324] ss:$16 sps:$4 sm:$0xff]   ;;  %v2539_v63 = vld [vmem:[%s3671_s1 + $0x320] ss:$16 sps:$4 sm:$0xff]  }
  0x20   :  { %1342 = vmatpush1.bf16.msra.mxu1 %v2497_v31  ;;  %1302 = vmatprep.subr.bf16.mxu0 %v2498_v32  ;;  %v2540_v0 = vld [vmem:[%s3671_s1 + $0x104] ss:$16 sps:$4 sm:$0xff]   ;;  %v2544_v2 = vld [vmem:[%s3671_s1 + $0x100] ss:$16 sps:$4 sm:$0xff]   ;;  %v2584_v31 = vld [vmem:[%s3671_s1 + $0x88] ss:$16 sps:$4 sm:$0xff]  }
  0x21   :  { %1343 = vmatprep.subr.bf16.mxu1 %v2500_v33  ;;  %v2542_v1 = vld [vmem:[%s3671_s1 + $0x304] ss:$16 sps:$4 sm:$0xff]   ;;  %v2545_v3 = vld [vmem:[%s3671_s1 + $0x300] ss:$16 sps:$4 sm:$0xff]   ;;  %v2592_v33 = vld [vmem:[%s3671_s1 + $0x6c] ss:$16 sps:$4 sm:$0xff]  }
  0x22   :  { %v2553_v4 = vld [vmem:[%s3671_s1 + $0x4e4] ss:$16 sps:$4 sm:$0xff]   ;;  %v2551_v8 = vld [vmem:[%s3671_s1 + $0x4e0] ss:$16 sps:$4 sm:$0xff]  }
  0x23   :  { %1303 = vmatpush2.bf16.msra.mxu0 %v2502_v34  ;;  %v2556_v5 = vld [vmem:[%s3671_s1 + $0x624] ss:$16 sps:$4 sm:$0xff]   ;;  %v2554_v9 = vld [vmem:[%s3671_s1 + $0x620] ss:$16 sps:$4 sm:$0xff]  }
  0x24   :  { %1344 = vmatpush2.bf16.msra.mxu1 %v2503_v35  ;;  %1304 = vmatprep.subr.bf16.mxu0 %v2504_v36  ;;  %v2559_v10 = vld [vmem:[%s3671_s1 + $0x4c4] ss:$16 sps:$4 sm:$0xff]   ;;  %v2557_v12 = vld [vmem:[%s3671_s1 + $0x4c0] ss:$16 sps:$4 sm:$0xff]  }
  0x25   :  { %1345 = vmatprep.subr.bf16.mxu1 %v2506_v37  ;;  %v2562_v11 = vld [vmem:[%s3671_s1 + $0x604] ss:$16 sps:$4 sm:$0xff]   ;;  %v2560_v13 = vld [vmem:[%s3671_s1 + $0x600] ss:$16 sps:$4 sm:$0xff]   ;;  %v2590_v37 = vld [vmem:[%s3671_s1 + $0x68] ss:$16 sps:$4 sm:$0xff]  }
  0x26   :  { %v2565_v14 = vld [vmem:[%s3671_s1 + $0x4a4] ss:$16 sps:$4 sm:$0xff]   ;;  %v2563_v18 = vld [vmem:[%s3671_s1 + $0x4a0] ss:$16 sps:$4 sm:$0xff]  }
  0x27   :  { %1305 = vmatpush2.bf16.msra.mxu0 %v2508_v38  ;;  %v2571_v20 = vld [vmem:[%s3671_s1 + $0x484] ss:$16 sps:$4 sm:$0xff]   ;;  %v2569_v22 = vld [vmem:[%s3671_s1 + $0x480] ss:$16 sps:$4 sm:$0xff]  }
  0x28   :  { %1346 = vmatpush2.bf16.msra.mxu1 %v2509_v39  ;;  %1306 = vmatprep.subr.bf16.mxu0 %v2510_v40  ;;  %v2577_v24 = vld [vmem:[%s3671_s1 + $0x464] ss:$16 sps:$4 sm:$0xff]   ;;  %v2575_v26 = vld [vmem:[%s3671_s1 + $0x460] ss:$16 sps:$4 sm:$0xff]   ;;  %v2598_v39 = vld [vmem:[%s3671_s1 + $0x4c] ss:$16 sps:$4 sm:$0xff]  }
  0x29   :  { %1347 = vmatprep.subr.bf16.mxu1 %v2512_v41  ;;  %v2583_v28 = vld [vmem:[%s3671_s1 + $0x444] ss:$16 sps:$4 sm:$0xff]   ;;  %v2581_v30 = vld [vmem:[%s3671_s1 + $0x440] ss:$16 sps:$4 sm:$0xff]   ;;  %v2596_v41 = vld [vmem:[%s3671_s1 + $0x48] ss:$16 sps:$4 sm:$0xff]  }
  0x2a   :  { %v2589_v32 = vld [vmem:[%s3671_s1 + $0x424] ss:$16 sps:$4 sm:$0xff]   ;;  %v2587_v35 = vld [vmem:[%s3671_s1 + $0x420] ss:$16 sps:$4 sm:$0xff]  }
  0x2b   :  { %1307 = vmatpush2.bf16.msra.mxu0 %v2514_v42  ;;  %v3166_v34 = vld [vmem:[%s3672_s0 + $0x10] sm:$0xff] }
  0x2c   :  { %1348 = vmatpush2.bf16.msra.mxu1 %v2515_v43  ;;  %1308 = vmatprep.subr.bf16.mxu0 %v2516_v44  ;;  %v3173_v36 = vcombine.high %v3166_v34, %v3166_v34  ;;  %v2595_v38 = vld [vmem:[%s3671_s1 + $0x404] ss:$16 sps:$4 sm:$0xff]   ;;  %v2593_v40 = vld [vmem:[%s3671_s1 + $0x400] ss:$16 sps:$4 sm:$0xff]   ;;  %v2604_v43 = vld [vmem:[%s3671_s1 + $0x2c] ss:$16 sps:$4 sm:$0xff]  }
  0x2d   :  { %1349 = vmatprep.subr.bf16.mxu1 %v2518_v45  ;;  %v2601_v42 = vld [vmem:[%s3671_s1 + $0x5e4] ss:$16 sps:$4 sm:$0xff]   ;;  %v2599_v44 = vld [vmem:[%s3671_s1 + $0x5e0] ss:$16 sps:$4 sm:$0xff]   ;;  %v2602_v45 = vld [vmem:[%s3671_s1 + $0x28] ss:$16 sps:$4 sm:$0xff]  }
  0x2e   :  { %v2613_v50 = vld [vmem:[%s3671_s1 + $0x5a4] ss:$16 sps:$4 sm:$0xff]  }
  0x2f   :  { %1309 = vmatpush2.bf16.msra.mxu0 %v2520_v46  ;;  %v2607_v46 = vld [vmem:[%s3671_s1 + $0x5c4] ss:$16 sps:$4 sm:$0xff]  }
  0x30   :  { %1350 = vmatpush2.bf16.msra.mxu1 %v2521_v48  ;;  %1310 = vmatprep.subr.bf16.mxu0 %v2522_v51  ;;  %v2605_v48 = vld [vmem:[%s3671_s1 + $0x5c0] ss:$16 sps:$4 sm:$0xff]   ;;  %v2616_v51 = vld [vmem:[%s3671_s1 + $0x1ec] ss:$16 sps:$4 sm:$0xff]  }
  0x31   :  { %1351 = vmatprep.subr.bf16.mxu1 %v2524_v53  ;;  %v2611_v53 = vld [vmem:[%s3671_s1 + $0x5a0] ss:$16 sps:$4 sm:$0xff]  }
  0x33   :  { %1311 = vmatpush2.bf16.msra.mxu0 %v2526_v54  ;;  %v2614_v54 = vld [vmem:[%s3671_s1 + $0x1e8] ss:$16 sps:$4 sm:$0xff]  }
  0x34   :  { %1352 = vmatpush2.bf16.msra.mxu1 %v2527_v55  ;;  %1312 = vmatprep.subr.bf16.mxu0 %v2528_v56  ;;  %v2619_v55 = vld [vmem:[%s3671_s1 + $0x584] ss:$16 sps:$4 sm:$0xff]   ;;  %v2622_v56 = vld [vmem:[%s3671_s1 + $0x1cc] ss:$16 sps:$4 sm:$0xff]  }
  0x35   :  { %1353 = vmatprep.subr.bf16.mxu1 %v2530_v57  ;;  %v2617_v57 = vld [vmem:[%s3671_s1 + $0x580] ss:$16 sps:$4 sm:$0xff]  }
  0x37   :  { %1313 = vmatpush2.bf16.msra.mxu0 %v2532_v58  ;;  %v2620_v58 = vld [vmem:[%s3671_s1 + $0x1c8] ss:$16 sps:$4 sm:$0xff]  }
  0x38   :  { %1354 = vmatpush2.bf16.msra.mxu1 %v2533_v59  ;;  %1314 = vmatprep.subr.bf16.mxu0 %v2534_v60  ;;  %v2625_v59 = vld [vmem:[%s3671_s1 + $0x564] ss:$16 sps:$4 sm:$0xff]   ;;  %v2628_v60 = vld [vmem:[%s3671_s1 + $0x1ac] ss:$16 sps:$4 sm:$0xff]  }
  0x39   :  { %1355 = vmatprep.subr.bf16.mxu1 %v2536_v61  ;;  %v2623_v61 = vld [vmem:[%s3671_s1 + $0x560] ss:$16 sps:$4 sm:$0xff]  }
  0x3b   :  { %1315 = vmatpush2.bf16.msra.mxu0 %v2538_v62  ;;  %v2626_v62 = vld [vmem:[%s3671_s1 + $0x1a8] ss:$16 sps:$4 sm:$0xff]  }
  0x3c   :  { %1356 = vmatpush2.bf16.msra.mxu1 %v2539_v63  ;;  %1316 = vmatprep.subr.bf16.mxu0 %v2540_v0  ;;  %v2631_v63 = vld [vmem:[%s3671_s1 + $0x544] ss:$16 sps:$4 sm:$0xff]   ;;  %v2634_v0 = vld [vmem:[%s3671_s1 + $0x18c] ss:$16 sps:$4 sm:$0xff]  }
  0x3d   :  { %1357 = vmatprep.subr.bf16.mxu1 %v2542_v1  ;;  %v2629_v1 = vld [vmem:[%s3671_s1 + $0x540] ss:$16 sps:$4 sm:$0xff]  }
  0x3f   :  { %1317 = vmatpush2.bf16.msra.mxu0 %v2544_v2  ;;  %v2632_v2 = vld [vmem:[%s3671_s1 + $0x188] ss:$16 sps:$4 sm:$0xff]  }
  0x40   :  { %1358 = vmatpush2.bf16.msra.mxu1 %v2545_v3  ;;  %1368 = vmatprep.subr.bf16.mxu0 %v2553_v4  ;;  %v2637_v3 = vld [vmem:[%s3671_s1 + $0x524] ss:$16 sps:$4 sm:$0xff]   ;;  %v2640_v4 = vld [vmem:[%s3671_s1 + $0x16c] ss:$16 sps:$4 sm:$0xff]  }
  0x41   :  { %1421 = vmatprep.subr.bf16.mxu1 %v2556_v5  ;;  %v2635_v5 = vld [vmem:[%s3671_s1 + $0x520] ss:$16 sps:$4 sm:$0xff]  }
  0x42   :  { %1319 = vmatmul.mubr.bf16.vlgmr.msra.gmra.mxu0 %v3076_v6 }
  0x43   :  { %1360 = vmatmul.mubr.bf16.vlgmr.msra.gmra.mxu1 %v3078_v7  ;;  %1369 = vmatpush1.bf16.msra.mxu0 %v2551_v8  ;;  %v2638_v8 = vld [vmem:[%s3671_s1 + $0x168] ss:$16 sps:$4 sm:$0xff]  }
  0x44   :  { %1422 = vmatpush1.bf16.msra.mxu1 %v2554_v9  ;;  %1370 = vmatprep.subr.bf16.mxu0 %v2559_v10  ;;  %v2643_v9 = vld [vmem:[%s3671_s1 + $0x504] ss:$16 sps:$4 sm:$0xff]   ;;  %v2646_v10 = vld [vmem:[%s3671_s1 + $0x14c] ss:$16 sps:$4 sm:$0xff]  }
  0x45   :  { %1423 = vmatprep.subr.bf16.mxu1 %v2562_v11  ;;  %1441 = vmatprep.mubr.bf16.mxu1 %v2803_v17  ;;  %v2641_v11 = vld [vmem:[%s3671_s1 + $0x500] ss:$16 sps:$4 sm:$0xff]  }
  0x46   :  { %1400 = vmatprep.mubr.bf16.mxu0 %v3173_v36 }
  0x47   :  { %1371 = vmatpush1.bf16.msra.mxu0 %v2557_v12  ;;  %v2644_v12 = vld [vmem:[%s3671_s1 + $0x148] ss:$16 sps:$4 sm:$0xff]  }
  0x48   :  { %1424 = vmatpush1.bf16.msra.mxu1 %v2560_v13  ;;  %1372 = vmatprep.subr.bf16.mxu0 %v2565_v14  ;;  %v2651_v13 = vld [vmem:[%s3671_s1 + $0x12c] ss:$16 sps:$4 sm:$0xff]  }
  0x49   :  { %1450 = vmatprep.subr.bf16.mxu1 %v2568_v15  ;;  %v2654_v14 = vld [vmem:[%s3671_s1 + $0x2ec] ss:$16 sps:$4 sm:$0xff]   ;;  %v3295_v15 = vcombine.low %v3166_v34, %v3166_v34 }
  0x4a   :  { %v2681_v34 = vld [vmem:[%s3671_s1 + $0x24c] ss:$16 sps:$4 sm:$0xff]  }
  0x4b   :  { %2330 = vmatmul.mubr.msk.bf16.vlgmr.msra.gmra.mxu1 %vm1282_vm0, %v3109_v16  ;;  %1373 = vmatpush1.bf16.msra.mxu0 %v2563_v18  ;;  %v2649_v18 = vld [vmem:[%s3671_s1 + $0x128] ss:$16 sps:$4 sm:$0xff]  }
  0x4c   :  { %1451 = vmatpush1.bf16.msra.mxu1 %v2566_v19  ;;  %1374 = vmatprep.subr.bf16.mxu0 %v2571_v20  ;;  %v2652_v19 = vld [vmem:[%s3671_s1 + $0x2e8] ss:$16 sps:$4 sm:$0xff]   ;;  %v2657_v20 = vld [vmem:[%s3671_s1 + $0x10c] ss:$16 sps:$4 sm:$0xff]  }
  0x4d   :  { %1452 = vmatprep.subr.bf16.mxu1 %v2574_v21  ;;  %1482 = vmatprep.mubr.bf16.mxu1 %v3013_v49  ;;  %v2608_v49 = vld [vmem:[%s3671_s1 + $0x8] ss:$16 sps:$4 sm:$0xff]   ;;  %v2660_v21 = vld [vmem:[%s3671_s1 + $0x2cc] ss:$16 sps:$4 sm:$0xff]  }
  0x4f   :  { %1375 = vmatpush1.bf16.msra.mxu0 %v2569_v22  ;;  %v2655_v22 = vld [vmem:[%s3671_s1 + $0x108] ss:$16 sps:$4 sm:$0xff]  }
  0x50   :  { %1453 = vmatpush1.bf16.msra.mxu1 %v2572_v23  ;;  %1376 = vmatprep.subr.bf16.mxu0 %v2577_v24  ;;  %v2658_v23 = vld [vmem:[%s3671_s1 + $0x2c8] ss:$16 sps:$4 sm:$0xff]   ;;  %v2663_v24 = vld [vmem:[%s3671_s1 + $0x2ac] ss:$16 sps:$4 sm:$0xff]  }
  0x51   :  { %1454 = vmatprep.subr.bf16.mxu1 %v2580_v25  ;;  %v2666_v25 = vld [vmem:[%s3671_s1 + $0x4ec] ss:$16 sps:$4 sm:$0xff]  }
  0x53   :  { %1377 = vmatpush1.bf16.msra.mxu0 %v2575_v26  ;;  %v2661_v26 = vld [vmem:[%s3671_s1 + $0x2a8] ss:$16 sps:$4 sm:$0xff]  }
  0x54   :  { %1455 = vmatpush1.bf16.msra.mxu1 %v2578_v27  ;;  %1378 = vmatprep.subr.bf16.mxu0 %v2583_v28  ;;  %v2664_v27 = vld [vmem:[%s3671_s1 + $0x4e8] ss:$16 sps:$4 sm:$0xff]   ;;  %v2669_v28 = vld [vmem:[%s3671_s1 + $0x28c] ss:$16 sps:$4 sm:$0xff]  }
  0x55   :  { %1456 = vmatprep.subr.bf16.mxu1 %v2586_v29  ;;  %v2667_v29 = vld [vmem:[%s3671_s1 + $0x288] ss:$16 sps:$4 sm:$0xff]  }
  0x57   :  { %1379 = vmatpush1.bf16.msra.mxu0 %v2581_v30  ;;  %v2670_v30 = vld [vmem:[%s3671_s1 + $0x4c8] ss:$16 sps:$4 sm:$0xff]  }
  0x58   :  { %1457 = vmatpush1.bf16.msra.mxu1 %v2584_v31  ;;  %1380 = vmatprep.subr.bf16.mxu0 %v2589_v32  ;;  %v2675_v31 = vld [vmem:[%s3671_s1 + $0x26c] ss:$16 sps:$4 sm:$0xff]   ;;  %v2673_v32 = vld [vmem:[%s3671_s1 + $0x268] ss:$16 sps:$4 sm:$0xff]  }
  0x59   :  { %1458 = vmatprep.subr.bf16.mxu1 %v2592_v33  ;;  %v2676_v33 = vld [vmem:[%s3671_s1 + $0x4a8] ss:$16 sps:$4 sm:$0xff]  }
  0x5b   :  { %1381 = vmatpush1.bf16.msra.mxu0 %v2587_v35  ;;  %v2684_v35 = vld [vmem:[%s3671_s1 + $0x48c] ss:$16 sps:$4 sm:$0xff]  }
  0x5c   :  { %1459 = vmatpush1.bf16.msra.mxu1 %v2590_v37  ;;  %1382 = vmatprep.subr.bf16.mxu0 %v2595_v38  ;;  %v2682_v37 = vld [vmem:[%s3671_s1 + $0x488] ss:$16 sps:$4 sm:$0xff]   ;;  %v2687_v38 = vld [vmem:[%s3671_s1 + $0x22c] ss:$16 sps:$4 sm:$0xff]  }
  0x5d   :  { %1460 = vmatprep.subr.bf16.mxu1 %v2598_v39  ;;  %v2690_v39 = vld [vmem:[%s3671_s1 + $0x46c] ss:$16 sps:$4 sm:$0xff]  }
  0x5f   :  { %1383 = vmatpush1.bf16.msra.mxu0 %v2593_v40  ;;  %v2685_v40 = vld [vmem:[%s3671_s1 + $0x228] ss:$16 sps:$4 sm:$0xff]  }
  0x60   :  { %1461 = vmatpush1.bf16.msra.mxu1 %v2596_v41  ;;  %1384 = vmatprep.subr.bf16.mxu0 %v2601_v42  ;;  %v2688_v41 = vld [vmem:[%s3671_s1 + $0x468] ss:$16 sps:$4 sm:$0xff]   ;;  %v2693_v42 = vld [vmem:[%s3671_s1 + $0x20c] ss:$16 sps:$4 sm:$0xff]  }
  0x61   :  { %1462 = vmatprep.subr.bf16.mxu1 %v2604_v43  ;;  %v2696_v43 = vld [vmem:[%s3671_s1 + $0x44c] ss:$16 sps:$4 sm:$0xff]  }
  0x63   :  { %1385 = vmatpush2.bf16.msra.mxu0 %v2599_v44  ;;  %v2691_v44 = vld [vmem:[%s3671_s1 + $0x208] ss:$16 sps:$4 sm:$0xff]  }
  0x64   :  { %1463 = vmatpush1.bf16.msra.mxu1 %v2602_v45  ;;  %1386 = vmatprep.subr.bf16.mxu0 %v2607_v46  ;;  %v2694_v45 = vld [vmem:[%s3671_s1 + $0x448] ss:$16 sps:$4 sm:$0xff]   ;;  %v2699_v46 = vld [vmem:[%s3671_s1 + $0x3ec] ss:$16 sps:$4 sm:$0xff]  }
  0x65   :  { %1464 = vmatprep.subr.bf16.mxu1 %v2610_v47  ;;  %v2702_v47 = vld [vmem:[%s3671_s1 + $0x42c] ss:$16 sps:$4 sm:$0xff]  }
  0x67   :  { %1387 = vmatpush2.bf16.msra.mxu0 %v2605_v48  ;;  %v2697_v48 = vld [vmem:[%s3671_s1 + $0x3e8] ss:$16 sps:$4 sm:$0xff]  }
  0x68   :  { %1465 = vmatpush1.bf16.msra.mxu1 %v2608_v49  ;;  %1388 = vmatprep.subr.bf16.mxu0 %v2613_v50  ;;  %v2700_v49 = vld [vmem:[%s3671_s1 + $0x428] ss:$16 sps:$4 sm:$0xff]   ;;  %v2705_v50 = vld [vmem:[%s3671_s1 + $0x3cc] ss:$16 sps:$4 sm:$0xff]  }
  0x69   :  { %1466 = vmatprep.subr.bf16.mxu1 %v2616_v51  ;;  %v2708_v51 = vld [vmem:[%s3671_s1 + $0x40c] ss:$16 sps:$4 sm:$0xff]  }
  0x6b   :  { %1389 = vmatpush2.bf16.msra.mxu0 %v2611_v53  ;;  %v2703_v53 = vld [vmem:[%s3671_s1 + $0x3c8] ss:$16 sps:$4 sm:$0xff]  }
  0x6c   :  { %1467 = vmatpush2.bf16.msra.mxu1 %v2614_v54  ;;  %1390 = vmatprep.subr.bf16.mxu0 %v2619_v55  ;;  %v2706_v54 = vld [vmem:[%s3671_s1 + $0x408] ss:$16 sps:$4 sm:$0xff]   ;;  %v2711_v55 = vld [vmem:[%s3671_s1 + $0x3ac] ss:$16 sps:$4 sm:$0xff]  }
  0x6d   :  { %1468 = vmatprep.subr.bf16.mxu1 %v2622_v56  ;;  %v2714_v56 = vld [vmem:[%s3671_s1 + $0x5ec] ss:$16 sps:$4 sm:$0xff]  }
  0x6f   :  { %1391 = vmatpush2.bf16.msra.mxu0 %v2617_v57  ;;  %v2709_v57 = vld [vmem:[%s3671_s1 + $0x3a8] ss:$16 sps:$4 sm:$0xff]  }
  0x70   :  { %1469 = vmatpush2.bf16.msra.mxu1 %v2620_v58  ;;  %1392 = vmatprep.subr.bf16.mxu0 %v2625_v59  ;;  %v2712_v58 = vld [vmem:[%s3671_s1 + $0x5e8] ss:$16 sps:$4 sm:$0xff]   ;;  %v2717_v59 = vld [vmem:[%s3671_s1 + $0x38c] ss:$16 sps:$4 sm:$0xff]  }
  0x71   :  { %1470 = vmatprep.subr.bf16.mxu1 %v2628_v60  ;;  %v2720_v60 = vld [vmem:[%s3671_s1 + $0x5cc] ss:$16 sps:$4 sm:$0xff]  }
  0x73   :  { %1393 = vmatpush2.bf16.msra.mxu0 %v2623_v61  ;;  %v2715_v61 = vld [vmem:[%s3671_s1 + $0x388] ss:$16 sps:$4 sm:$0xff]  }
  0x74   :  { %1471 = vmatpush2.bf16.msra.mxu1 %v2626_v62  ;;  %1394 = vmatprep.subr.bf16.mxu0 %v2631_v63  ;;  %v2718_v62 = vld [vmem:[%s3671_s1 + $0x5c8] ss:$16 sps:$4 sm:$0xff]   ;;  %v2723_v63 = vld [vmem:[%s3671_s1 + $0x36c] ss:$16 sps:$4 sm:$0xff]  }
  0x75   :  { %1472 = vmatprep.subr.bf16.mxu1 %v2634_v0  ;;  %v2726_v0 = vld [vmem:[%s3671_s1 + $0x5ac] ss:$16 sps:$4 sm:$0xff]  }
  0x77   :  { %1395 = vmatpush2.bf16.msra.mxu0 %v2629_v1  ;;  %v2721_v1 = vld [vmem:[%s3671_s1 + $0x368] ss:$16 sps:$4 sm:$0xff]  }
  0x78   :  { %1473 = vmatpush2.bf16.msra.mxu1 %v2632_v2  ;;  %1396 = vmatprep.subr.bf16.mxu0 %v2637_v3  ;;  %v2724_v2 = vld [vmem:[%s3671_s1 + $0x5a8] ss:$16 sps:$4 sm:$0xff]   ;;  %v2729_v3 = vld [vmem:[%s3671_s1 + $0x34c] ss:$16 sps:$4 sm:$0xff]  }
  0x79   :  { %1474 = vmatprep.subr.bf16.mxu1 %v2640_v4  ;;  %v2732_v4 = vld [vmem:[%s3671_s1 + $0x58c] ss:$16 sps:$4 sm:$0xff]  }
  0x7b   :  { %1397 = vmatpush2.bf16.msra.mxu0 %v2635_v5  ;;  %v2727_v5 = vld [vmem:[%s3671_s1 + $0x348] ss:$16 sps:$4 sm:$0xff]  }
  0x7c   :  { %1475 = vmatpush2.bf16.msra.mxu1 %v2638_v8  ;;  %1398 = vmatprep.subr.bf16.mxu0 %v2643_v9  ;;  %v2730_v8 = vld [vmem:[%s3671_s1 + $0x588] ss:$16 sps:$4 sm:$0xff]   ;;  %v2735_v9 = vld [vmem:[%s3671_s1 + $0x32c] ss:$16 sps:$4 sm:$0xff]  }
  0x7d   :  { %1476 = vmatprep.subr.bf16.mxu1 %v2646_v10  ;;  %v2738_v10 = vld [vmem:[%s3671_s1 + $0x56c] ss:$16 sps:$4 sm:$0xff]  }
  0x7f   :  { %1399 = vmatpush2.bf16.msra.mxu0 %v2641_v11  ;;  %v2733_v11 = vld [vmem:[%s3671_s1 + $0x328] ss:$16 sps:$4 sm:$0xff]  }
  0x80   :  { %1477 = vmatpush2.bf16.msra.mxu1 %v2644_v12  ;;  %1491 = vmatprep.subr.bf16.mxu0 %v2654_v14  ;;  %v2736_v12 = vld [vmem:[%s3671_s1 + $0x568] ss:$16 sps:$4 sm:$0xff]   ;;  %v2744_v14 = vld [vmem:[%s3671_s1 + $0x54c] ss:$16 sps:$4 sm:$0xff]  }
  0x81   :  { %1478 = vmatprep.subr.bf16.mxu1 %v2651_v13  ;;  %v2741_v13 = vld [vmem:[%s3671_s1 + $0x30c] ss:$16 sps:$4 sm:$0xff]  }
  0x82   :  { %1401 = vmatmul.mubr.bf16.vlgmr.msra.gmra.mxu0 %v3295_v15 }
  0x83   :  { %1492 = vmatpush1.bf16.msra.mxu0 %v2652_v19  ;;  %1523 = vmatprep.mubr.bf16.mxu0 %v3021_v52  ;;  %v2672_v52 = vld [vmem:[%s3671_s1 + $0x4cc] ss:$16 sps:$4 sm:$0xff]   ;;  %v2742_v19 = vld [vmem:[%s3671_s1 + $0x548] ss:$16 sps:$4 sm:$0xff]  }
  0x84   :  { %1479 = vmatpush2.bf16.msra.mxu1 %v2649_v18  ;;  %1493 = vmatprep.subr.bf16.mxu0 %v2660_v21  ;;  %v2739_v18 = vld [vmem:[%s3671_s1 + $0x308] ss:$16 sps:$4 sm:$0xff]  }
  0x85   :  { %1480 = vmatprep.subr.bf16.mxu1 %v2657_v20  ;;  %v2747_v20 = vld [vmem:[%s3671_s1 + $0x52c] ss:$16 sps:$4 sm:$0xff]  }
  0x86   :  { %v2757_v21 = vld [vmem:[%s3673_s3 + $0x78] sm:$0xff]  }
  0x87   :  { %1494 = vmatpush1.bf16.msra.mxu0 %v2658_v23  ;;  %v2758_v23 = vld [vmem:[%s3673_s3 + $0x38] sm:$0xff]  }
  0x88   :  { %1481 = vmatpush2.bf16.msra.mxu1 %v2655_v22  ;;  %1495 = vmatprep.subr.bf16.mxu0 %v2663_v24  ;;  %v2745_v22 = vld [vmem:[%s3671_s1 + $0x528] ss:$16 sps:$4 sm:$0xff]   ;;  %v2750_v24 = vld [vmem:[%s3671_s1 + $0x50c] ss:$16 sps:$4 sm:$0xff]  }
  0x89   :  { %1532 = vmatprep.subr.bf16.mxu1 %v2666_v25  ;;  %v2759_v25 = vld [vmem:[%s3673_s3 + $0x70] sm:$0xff]  }
  0x8b   :  { %1483 = vmatmul.mubr.bf16.vlgmr.msra.gmra.mxu1 %v3076_v6  ;;  %1496 = vmatpush1.bf16.msra.mxu0 %v2661_v26  ;;  %v2678_v6 = vld [vmem:[%s3671_s1 + $0x4ac] ss:$16 sps:$4 sm:$0xff]   ;;  %v2748_v26 = vld [vmem:[%s3671_s1 + $0x508] ss:$16 sps:$4 sm:$0xff]  }
  0x8c   :  { %1533 = vmatpush1.bf16.msra.mxu1 %v2664_v27  ;;  %1497 = vmatprep.subr.bf16.mxu0 %v2669_v28  ;;  %v2760_v27 = vld [vmem:[%s3673_s3 + $0x30] sm:$0xff]   ;;  %v2753_v28 = vld [vmem:[%s3671_s1 + $0x62c] ss:$16 sps:$4 sm:$0xff]  }
  0x8d   :  { %1534 = vmatprep.subr.bf16.mxu1 %v2672_v52  ;;  %1564 = vmatprep.mubr.bf16.mxu1 %v3173_v36  ;;  %v2679_v36 = vld [vmem:[%s3671_s1 + $0x248] ss:$16 sps:$4 sm:$0xff]  }
  0x8e   :  { %v2751_v52 = vld [vmem:[%s3671_s1 + $0x628] ss:$16 sps:$4 sm:$0xff]  }
  0x8f   :  { %1498 = vmatpush1.bf16.msra.mxu0 %v2667_v29  ;;  %v2756_v29 = vld [vmem:[%s3671_s1 + $0x60c] ss:$16 sps:$4 sm:$0xff]  }
  0x90   :  { %1535 = vmatpush1.bf16.msra.mxu1 %v2670_v30  ;;  %1499 = vmatprep.subr.bf16.mxu0 %v2675_v31  ;;  %v2762_v30 = vld [vmem:[%s3673_s3 + $0x28] sm:$0xff]   ;;  %v2763_v31 = vld [vmem:[%s3673_s3 + $0x60] sm:$0xff]  }
  0x91   :  { %1536 = vmatprep.subr.bf16.mxu1 %v2678_v6  ;;  %v2754_v6 = vld [vmem:[%s3671_s1 + $0x608] ss:$16 sps:$4 sm:$0xff]  }
  0x93   :  { %1500 = vmatpush1.bf16.msra.mxu0 %v2673_v32  ;;  %v2764_v32 = vld [vmem:[%s3673_s3 + $0x20] sm:$0xff]  }
  0x94   :  { %1537 = vmatpush1.bf16.msra.mxu1 %v2676_v33  ;;  %1501 = vmatprep.subr.bf16.mxu0 %v2681_v34  ;;  %v2765_v33 = vld [vmem:[%s3673_s3 + $0x58] sm:$0xff]  }
  0x95   :  { %1538 = vmatprep.subr.bf16.mxu1 %v2684_v35  ;;  %v2774_v34 = vld [vmem:[%s3673_s3 + $0xb8] sm:$0xff]   ;;  %v2775_v35 = vld [vmem:[%s3673_s3 + $0xf0] sm:$0xff]  }
  0x97   :  { %1502 = vmatpush1.bf16.msra.mxu0 %v2679_v36  ;;  %v2767_v36 = vld [vmem:[%s3673_s3 + $0x50] sm:$0xff]  }
  0x98   :  { %1539 = vmatpush1.bf16.msra.mxu1 %v2682_v37  ;;  %1503 = vmatprep.subr.bf16.mxu0 %v2687_v38  ;;  %v2776_v37 = vld [vmem:[%s3673_s3 + $0xb0] sm:$0xff]  }
  0x99   :  { %1540 = vmatprep.subr.bf16.mxu1 %v2690_v39  ;;  %v2768_v38 = vld [vmem:[%s3673_s3 + $0x10] sm:$0xff]   ;;  %v2769_v39 = vld [vmem:[%s3673_s3 + $0x48] sm:$0xff]  }
  0x9b   :  { %1504 = vmatpush1.bf16.msra.mxu0 %v2685_v40  ;;  %v2771_v40 = vld [vmem:[%s3673_s3 + $0x40] sm:$0xff]  }
  0x9c   :  { %1541 = vmatpush1.bf16.msra.mxu1 %v2688_v41  ;;  %1505 = vmatprep.subr.bf16.mxu0 %v2693_v42  ;;  %v2772_v41 = vld [vmem:[%s3673_s3] sm:$0xff]  }
  0x9d   :  { %1542 = vmatprep.subr.bf16.mxu1 %v2696_v43 }
  0x9f   :  { %1506 = vmatpush1.bf16.msra.mxu0 %v2691_v44  ;;  %v2777_v44 = vld [vmem:[%s3673_s3 + $0xe8] sm:$0xff]  }
  0xa0   :  { %1543 = vmatpush1.bf16.msra.mxu1 %v2694_v45  ;;  %1507 = vmatprep.subr.bf16.mxu0 %v2699_v46  ;;  %v2778_v45 = vld [vmem:[%s3673_s3 + $0xa8] sm:$0xff]  }
  0xa1   :  { %1544 = vmatprep.subr.bf16.mxu1 %v2702_v47 }
  0xa3   :  { %1508 = vmatpush2.bf16.msra.mxu0 %v2697_v48  ;;  %v2779_v48 = vld [vmem:[%s3673_s3 + $0xe0] sm:$0xff]  }
  0xa4   :  { %1545 = vmatpush1.bf16.msra.mxu1 %v2700_v49  ;;  %1509 = vmatprep.subr.bf16.mxu0 %v2705_v50  ;;  %v2780_v49 = vld [vmem:[%s3673_s3 + $0xa0] sm:$0xff]  }
  0xa5   :  { %1546 = vmatprep.subr.bf16.mxu1 %v2708_v51 }
  0xa7   :  { %1510 = vmatpush2.bf16.msra.mxu0 %v2703_v53 }
  0xa8   :  { %1547 = vmatpush1.bf16.msra.mxu1 %v2706_v54  ;;  %1511 = vmatprep.subr.bf16.mxu0 %v2711_v55 }
  0xa9   :  { %1548 = vmatprep.subr.bf16.mxu1 %v2714_v56  ;;  %v2781_v56 = vld [vmem:[%s3673_s3 + $0xd8] sm:$0xff]  }
  0xab   :  { %1512 = vmatpush2.bf16.msra.mxu0 %v2709_v57  ;;  %v2782_v57 = vld [vmem:[%s3673_s3 + $0x98] sm:$0xff]  }
  0xac   :  { %1549 = vmatpush2.bf16.msra.mxu1 %v2712_v58  ;;  %1513 = vmatprep.subr.bf16.mxu0 %v2717_v59 }
  0xad   :  { %1550 = vmatprep.subr.bf16.mxu1 %v2720_v60  ;;  %v2783_v60 = vld [vmem:[%s3673_s3 + $0xd0] sm:$0xff]  }
  0xaf   :  { %1514 = vmatpush2.bf16.msra.mxu0 %v2715_v61  ;;  %v2784_v61 = vld [vmem:[%s3673_s3 + $0x90] sm:$0xff]  }
  0xb0   :  { %1551 = vmatpush2.bf16.msra.mxu1 %v2718_v62  ;;  %1515 = vmatprep.subr.bf16.mxu0 %v2723_v63  ;;  %v2785_v63 = vld [vmem:[%s3673_s3 + $0xc8] sm:$0xff]  }
  0xb1   :  { %1552 = vmatprep.subr.bf16.mxu1 %v2726_v0  ;;  %v2786_v0 = vld [vmem:[%s3673_s3 + $0x88] sm:$0xff]  }
  0xb3   :  { %1516 = vmatpush2.bf16.msra.mxu0 %v2721_v1  ;;  %v2787_v1 = vld [vmem:[%s3673_s3 + $0xc0] sm:$0xff]  }
  0xb4   :  { %1553 = vmatpush2.bf16.msra.mxu1 %v2724_v2  ;;  %1517 = vmatprep.subr.bf16.mxu0 %v2729_v3  ;;  %v2788_v2 = vld [vmem:[%s3673_s3 + $0x80] sm:$0xff]   ;;  %v238_v3 = vlaneseq }
  0xb5   :  { %1554 = vmatprep.subr.bf16.mxu1 %v2732_v4 }
  0xb6   :  { %v239_v4 = vshrl.u32 %v238_v3, 7 }
  0xb7   :  { %1518 = vmatpush2.bf16.msra.mxu0 %v2727_v5 }
  0xb8   :  { %1555 = vmatpush2.bf16.msra.mxu1 %v2730_v8  ;;  %1519 = vmatprep.subr.bf16.mxu0 %v2735_v9  ;;  %v240_v5 = vsub.s32 0, %v239_v4  ;;  %v236_v8 = vld [vmem:[%s3674_s2] sm:$0xf]  ;;  %v244_v9 = vsub.s32 1, %v239_v4 }
  0xb9   :  { %1556 = vmatprep.subr.bf16.mxu1 %v2738_v10 }
  0xba   :  { %v241_v10 = vrot.slane %v236_v8, %v240_v5 }
  0xbb   :  { %1520 = vmatpush2.bf16.msra.mxu0 %v2733_v11  ;;  %v245_v11 = vrot.slane %v236_v8, %v244_v9 }
  0xbc   :  { %1557 = vmatpush2.bf16.msra.mxu1 %v2736_v12  ;;  %1521 = vmatprep.subr.bf16.mxu0 %v2741_v13 }
  0xbd   :  { %1558 = vmatprep.subr.bf16.mxu1 %v2744_v14 }
  0xbf   :  { %1522 = vmatpush2.bf16.msra.mxu0 %v2739_v18 }
  0xc0   :  { %1559 = vmatpush2.bf16.msra.mxu1 %v2742_v19  ;;  %2374 = vmatprep.subr.bf16.mxu0 %v2757_v21 }
  0xc1   :  { %1560 = vmatprep.subr.bf16.mxu1 %v2747_v20 }
  0xc2   :  { %1524 = vmatmul.mubr.bf16.vlgmr.msra.gmra.mxu0 %v3078_v7  ;;  %v2761_v7 = vld [vmem:[%s3673_s3 + $0x68] sm:$0xff]  }
  0xc3   :  { %2375 = vmatpush3.bf16.msra.mxu0 %v2758_v23 }
  0xc4   :  { %1561 = vmatpush2.bf16.msra.mxu1 %v2745_v22  ;;  %2376 = vmatprep.subr.bf16.mxu0 %v2759_v25 }
  0xc5   :  { %1562 = vmatprep.subr.bf16.mxu1 %v2750_v24 }
  0xc7   :  { %2377 = vmatpush3.bf16.msra.mxu0 %v2760_v27 }
  0xc8   :  { %1563 = vmatpush2.bf16.msra.mxu1 %v2748_v26  ;;  %2378 = vmatprep.subr.bf16.mxu0 %v2761_v7 }
  0xc9   :  { %1585 = vmatprep.subr.bf16.mxu1 %v2753_v28 }
  0xcb   :  { %1565 = vmatmul.mubr.bf16.vlgmr.msra.gmra.mxu1 %v3295_v15  ;;  %2379 = vmatpush3.bf16.msra.mxu0 %v2762_v30  ;;  %v2766_v15 = vld [vmem:[%s3673_s3 + $0x18] sm:$0xff]  }
  0xcc   :  { %1586 = vmatpush1.bf16.msra.mxu1 %v2751_v52  ;;  %1605 = vmatprep.mubr.bf16.mxu1 %v2803_v17  ;;  %v2773_v17 = vld [vmem:[%s3673_s3 + $0xf8] sm:$0xff]  }
  0xcd   :  { %1587 = vmatprep.subr.bf16.mxu1 %v2756_v29  ;;  %2380 = vmatprep.subr.bf16.mxu0 %v2763_v31 }
  0xcf   :  { %2381 = vmatpush3.bf16.msra.mxu0 %v2764_v32 }
  0xd0   :  { %1588 = vmatpush1.bf16.msra.mxu1 %v2754_v6  ;;  %2382 = vmatprep.subr.bf16.mxu0 %v2765_v33 }
  0xd1   :  { %2396 = vmatprep.subr.bf16.mxu1 %v2773_v17 }
  0xd3   :  { %2331 = vmatmul.mubr.msk.bf16.vlgmr.msra.gmra.mxu1 %vm1282_vm0, %v3109_v16  ;;  %2383 = vmatpush3.bf16.msra.mxu0 %v2766_v15  ;;  %v2770_v16 = vld [vmem:[%s3673_s3 + $0x8] sm:$0xff]   ;;  %v248_v15 = vsub.s32 2, %v239_v4 }
  0xd4   :  { %2397 = vmatpush3.bf16.msra.mxu1 %v2774_v34  ;;  %2384 = vmatprep.subr.bf16.mxu0 %v2767_v36  ;;  %v252_v34 = vsub.s32 3, %v239_v4 }
  0xd5   :  { %2398 = vmatprep.subr.bf16.mxu1 %v2775_v35  ;;  %v249_v36 = vrot.slane %v236_v8, %v248_v15 }
  0xd7   :  { %2385 = vmatpush3.bf16.msra.mxu0 %v2768_v38  ;;  %v253_v38 = vrot.slane %v236_v8, %v252_v34 }
  0xd8   :  { %2399 = vmatpush3.bf16.msra.mxu1 %v2776_v37  ;;  %2386 = vmatprep.subr.bf16.mxu0 %v2769_v39 }
  0xd9   :  { %2400 = vmatprep.subr.bf16.mxu1 %v2777_v44 }
  0xdb   :  { %2387 = vmatpush3.bf16.msra.mxu0 %v2770_v16 }
  0xdc   :  { %2388 = vmatprep.subr.bf16.mxu0 %v2771_v40  ;;  %2401 = vmatpush3.bf16.msra.mxu1 %v2778_v45 }
  0xdd   :  { %2402 = vmatprep.subr.bf16.mxu1 %v2779_v48 }
  0xdf   :  { %2389 = vmatpush3.bf16.msra.mxu0 %v2772_v41 }
  0xe0   :  { %2403 = vmatpush3.bf16.msra.mxu1 %v2780_v49 }
  0xe1   :  { %2404 = vmatprep.subr.bf16.mxu1 %v2781_v56 }
  0xe4   :  { %2405 = vmatpush3.bf16.msra.mxu1 %v2782_v57  ;;  %v2790_v57 = vld [vmem:[%s3676_s5 + $0x30] sm:$0xff]  }
  0xe5   :  { %2406 = vmatprep.subr.bf16.mxu1 %v2783_v60  ;;  %v2791_v60 = vld [vmem:[%s3676_s5 + $0x28] sm:$0xff]  }
  0xe8   :  { %2407 = vmatpush3.bf16.msra.mxu1 %v2784_v61 }
  0xe9   :  { %2408 = vmatprep.subr.bf16.mxu1 %v2785_v63  ;;  %v2793_v63 = vld [vmem:[%s3676_s5 + $0x18] sm:$0xff]  }
  0xec   :  { %2409 = vmatpush3.bf16.msra.mxu1 %v2786_v0  ;;  %v2794_v0 = vld [vmem:[%s3676_s5 + $0x10] sm:$0xff]  }
  0xed   :  { %2410 = vmatprep.subr.bf16.mxu1 %v2787_v1  ;;  %v2795_v1 = vld [vmem:[%s3676_s5 + $0x8] sm:$0xff]  }
  0xf0   :  { %2411 = vmatpush3.bf16.msra.mxu1 %v2788_v2  ;;  %v2796_v2 = vld [vmem:[%s3676_s5] sm:$0xff]  }
 0x102   :  { %v1320_v42 = vpop.f32.mrf.mxu0 }
 0x103   :  { %v1361_v43 = vpop.f32.mrf.mxu1  ;;  %v1321_v12 = vadd.f32 %v1320_v42, %v241_v10 }
 0x104   :  { %v1322_v46 = vpop.f32.mrf.mxu0 }
 0x105   :  { %v1363_v47 = vpop.f32.mrf.mxu1  ;;  %v1323_v13 = vadd.f32 %v1322_v46, %v245_v11  ;;  %v1362_v14 = vadd.f32 %v1361_v43, %v1321_v12  ;;  %v2332_v11 = vld [vmem:[%s3677_s4] ss:$0 sm:$0xff] }
 0x106   :  { %v1324_v51 = vpop.f32.mrf.mxu0 }
 0x107   :  { %v1365_v50 = vpop.f32.mrf.mxu1  ;;  %v1364_v19 = vadd.f32 %v1363_v47, %v1323_v13 }
 0x108   :  { %v1325_v54 = vpop.f32.mrf.mxu0 }
 0x109   :  { %v1366_v53 = vpop.f32.mrf.mxu1  ;;  %v2789_v54 = vld [vmem:[%s3676_s5 + $0x38] sm:$0xff]  }
 0x10a   :  { %v2804_v53 = vmov 0.0  }
 0x10b   :  { %v1443_v55 = vpop.f32.mrf.mxu1  ;;  %2427 = vmatprep.subr.bf16.mxu0 %v2804_v53 }
 0x10d   :  { %v1445_v58 = vpop.f32.mrf.mxu1 }
 0x10f   :  { %v1447_v59 = vpop.f32.mrf.mxu1 }
 0x111   :  { %v1448_v62 = vpop.f32.mrf.mxu1 }
 0x112   :  { %v2792_v62 = vld [vmem:[%s3676_s5 + $0x20] sm:$0xff]  }
 0x142   :  { %v1402_v18 = vpop.f32.mrf.mxu0 }
 0x143   :  { %v1403_v20 = vadd.f32 %v1402_v18, %v1362_v14 }
 0x144   :  { %v1404_v21 = vpop.f32.mrf.mxu0 }
 0x145   :  { %v1444_v22 = vadd.f32 %v1443_v55, %v1403_v20  ;;  %v1405_v23 = vadd.f32 %v1404_v21, %v1364_v19 }
 0x146   :  { %v1406_v24 = vpop.f32.mrf.mxu0 }
 0x147   :  { %v1614_v25 = vmax.f32 %v1444_v22, 0.0  ;;  %v1446_v26 = vadd.f32 %v1445_v58, %v1405_v23  ;;  %v2085_v24 = vand.u32 127, %v238_v3 }
 0x148   :  { %v1407_v27 = vpop.f32.mrf.mxu0 }
 0x149   :  { %1618 = vst [vmem:[%s3675_s7] sm:$0xff] %v1614_v25  ;;  %v1615_v28 = vmax.f32 %v1446_v26, 0.0  ;;  %v1622_v29 = vpack.c.bf16 %v1614_v25, %v1614_v25  ;;  %v2365_v25 = vld [vmem:[%s3679_s6] ss:$0 sm:$0xff]  ;;  %vm2086_vm2 = vcmp.lt.s32.totalorder %v2085_v24, 10 }
 0x14b   :  { %v1484_v7 = vpop.f32.mrf.mxu1  ;;  %1619 = vst [vmem:[%s3675_s7 + $0x8] sm:$0xff] %v1615_v28  ;;  %v1623_v52 = vpack.c.bf16 %v1615_v28, %v1615_v28 }
 0x14c   :  { %v1485_v16 = vadd.f32 %v1484_v7, %v249_v36 }
 0x14d   :  { %v1486_v30 = vpop.f32.mrf.mxu1  ;;  %1921 = vmatprep.mubr.bf16.mxu0 %v1623_v52 }
 0x14e   :  { %1922 = vmatmul.mubr.bf16.vlgmr.msra.gmra.mxu0 %v1622_v29  ;;  %v1487_v41 = vadd.f32 %v1486_v30, %v253_v38 }
 0x14f   :  { %v1488_v31 = vpop.f32.mrf.mxu1  ;;  %2428 = vmatpush3.bf16.msra.mxu0 %v2789_v54  ;;  %2443 = vmatprep.mubr.msk.bf16.mxu0 %vm2805_vm1, %v2804_v53 }
 0x150   :  { %2429 = vmatprep.subr.bf16.mxu0 %v2804_v53 }
 0x151   :  { %v1489_v6 = vpop.f32.mrf.mxu1 }
 0x153   :  { %2430 = vmatpush3.bf16.msra.mxu0 %v2790_v57 }
 0x154   :  { %2431 = vmatprep.subr.bf16.mxu0 %v2804_v53 }
 0x157   :  { %2432 = vmatpush3.bf16.msra.mxu0 %v2791_v60 }
 0x158   :  { %2433 = vmatprep.subr.bf16.mxu0 %v2804_v53 }
 0x15b   :  { %2434 = vmatpush3.bf16.msra.mxu0 %v2792_v62 }
 0x15c   :  { %2435 = vmatprep.subr.bf16.mxu0 %v2804_v53 }
 0x15f   :  { %2436 = vmatpush3.bf16.msra.mxu0 %v2793_v63 }
 0x160   :  { %2437 = vmatprep.subr.bf16.mxu0 %v2804_v53 }
 0x163   :  { %2438 = vmatpush3.bf16.msra.mxu0 %v2794_v0 }
 0x164   :  { %2439 = vmatprep.subr.bf16.mxu0 %v2804_v53 }
 0x167   :  { %2440 = vmatpush3.bf16.msra.mxu0 %v2795_v1 }
 0x168   :  { %2441 = vmatprep.subr.bf16.mxu0 %v2804_v53 }
 0x16b   :  { %2442 = vmatpush3.bf16.msra.mxu0 %v2796_v2 }
 0x182   :  { %v1525_v32 = vpop.f32.mrf.mxu0 }
 0x183   :  { %v1526_v42 = vadd.f32 %v1525_v32, %v1485_v16 }
 0x184   :  { %v1527_v33 = vpop.f32.mrf.mxu0 }
 0x185   :  { %v1528_v44 = vadd.f32 %v1527_v33, %v1487_v41 }
 0x186   :  { %v1529_v17 = vpop.f32.mrf.mxu0 }
 0x188   :  { %v1530_v35 = vpop.f32.mrf.mxu0 }
 0x18b   :  { %v1566_v37 = vpop.f32.mrf.mxu1 }
 0x18c   :  { %v1567_v45 = vadd.f32 %v1566_v37, %v1526_v42 }
 0x18d   :  { %v1568_v39 = vpop.f32.mrf.mxu1 }
 0x18e   :  { %v1569_v47 = vadd.f32 %v1568_v39, %v1528_v44 }
 0x18f   :  { %v1570_v40 = vpop.f32.mrf.mxu1 }
 0x191   :  { %v1571_v43 = vpop.f32.mrf.mxu1 }
 0x193   :  { %v1607_v46 = vpop.f32.mrf.mxu1 }
 0x194   :  { %v1608_v48 = vadd.f32 %v1607_v46, %v1567_v45 }
 0x195   :  { %v1609_v49 = vpop.f32.mrf.mxu1 }
 0x196   :  { %v1616_v50 = vmax.f32 %v1608_v48, 0.0  ;;  %v1610_v51 = vadd.f32 %v1609_v49, %v1569_v47 }
 0x197   :  { %v1611_v55 = vpop.f32.mrf.mxu1 }
 0x198   :  { %1620 = vst [vmem:[%s3675_s7 + $0x10] sm:$0xff] %v1616_v50  ;;  %v1617_v56 = vmax.f32 %v1610_v51, 0.0  ;;  %v1624_v61 = vpack.c.bf16 %v1616_v50, %v1616_v50 }
 0x199   :  { %v1612_v58 = vpop.f32.mrf.mxu1 }
 0x19a   :  { %1621 = vst [vmem:[%s3675_s7 + $0x18] sm:$0xff] %v1617_v56  ;;  %v1625_v59 = vpack.c.bf16 %v1617_v56, %v1617_v56 }
 0x19c   :  { %1961 = vmatprep.mubr.bf16.mxu1 %v1625_v59 }
 0x19d   :  { %1962 = vmatmul.mubr.bf16.vlgmr.msra.gmra.mxu1 %v1624_v61 }
 0x20e   :  { %v2390_v4 = vpop.f32.mrf.mxu0 }
 0x210   :  { %v2391_v5 = vpop.f32.mrf.mxu0 }
 0x211   :  { %v2392_v8 = vadd.f32 %v2391_v5, %v2390_v4 }
 0x212   :  { %v2393_v9 = vpop.f32.mrf.mxu0 }
 0x213   :  { %v1924_v14 = vadd.f32 %v2392_v8, %v2332_v11 }
 0x214   :  { %v2394_v10 = vpop.f32.mrf.mxu0 }
 0x25d   :  { %v2412_v12 = vpop.f32.mrf.mxu1 }
 0x25f   :  { %v2413_v13 = vpop.f32.mrf.mxu1 }
 0x260   :  { %v2414_v18 = vadd.f32 %v2413_v13, %v2412_v12 }
 0x261   :  { %v2415_v19 = vpop.f32.mrf.mxu1 }
 0x262   :  { %v1964_v20 = vadd.f32 %v2414_v18, %v1924_v14 }
 0x263   :  { %v2416_v21 = vpop.f32.mrf.mxu1 }
 0x264   :  { %v1969_v22 = vmax.f32 %v1964_v20, 0.0 }
 0x266   :  { %1970 = vst [vmem:[%s3678_s8] sm:$0xff] %v1969_v22  ;;  %v1971_v23 = vpack.c.bf16 %v1969_v22, %v1969_v22 }
 0x268   :  { %2444 = vmatmul.mubr.bf16.vlgmr.msra.gmra.mxu0 %v1971_v23 }
 0x328   :  { %v2077_v26 = vpop.f32.mrf.mxu0 }
 0x329   :  { %v2078_v27 = vadd.f32 %v2365_v25, %v2077_v26 }
 0x32a   :  { %v2445_v28 = vpop.f32.mrf.mxu0 }
 0x32b   :  { %2083 = vst [vmem:[%s3680_s9] sm:$0xff] %v2078_v27  ;;  %v2087_v7 = vsel %vm2086_vm2, %v2078_v27, -1e+30 }
 0x32c   :  { %2088 = vmax.xlane.f32.xlu0 %v2087_v7  ;;  %v2080_v52 = vpop.f32.mrf.mxu0 }
 0x32e   :  { %v2446_v29 = vpop.f32.mrf.mxu0 }
 0x3b5   :  { %v2089_v30 = vpop.xlane.xlu0 %2088 }
 0x3b6   :  { %v2090_v31 = vsub.f32 %v2078_v27, %v2089_v30 }
 0x3b8   :  { %v2091_v6 = vmul.f32 1.442695, %v2090_v31 }
 0x3ba   :  { %2797 = vpow2.f32 %v2091_v6 }
 0x3c7   :  { %v2798_v3 = vpop.eup %2797 }
 0x3c8   :  { %v2093_v32 = vsel %vm2086_vm2, %v2798_v3, 0.0 }
 0x3c9   :  { %2094 = vadd.xlane.f32.xlu0 %v2093_v32 }
 0x452   :  { %v2095_v33 = vpop.xlane.xlu0 %2094 }
 0x453   :  { %2799 = vrcp.f32 %v2095_v33 }
 0x454   :  { %2801 = vlog2.f32 %v2095_v33 }
 0x460   :  { %v2800_v15 = vpop.eup %2799 }
 0x461   :  { %v2802_v17 = vpop.eup %2801  ;;  %v2097_v34 = vmul.f32 %v2800_v15, %v2093_v32 }
 0x462   :  { %v2100_v35 = vmul.f32 0.6931472, %v2802_v17 }
 0x463   :  { %2098 = vst [vmem:[%s3681_s10] sm:$0xff] %v2097_v34 }
 0x464   :  { %v2101_v36 = vsub.f32 %v2090_v31, %v2100_v35 }
 0x466   :  { %2102 = vst [vmem:[%s3682_s11] sm:$0xff] %v2101_v36 }

</bundles_post_ra>
